<compile_context>
chip_gen: v7x
topology: tpu7x:2x2x1
jax: 0.10.0
libtpu: 0.0.40
codegen_flags: <defaults>
</compile_context>

<pallas_src>
import functools

import jax
import jax.numpy as jnp
from jax import lax
from jax.experimental import pallas as pl
from jax.experimental.pallas import tpu as pltpu

NUM_HEADS = 4


# ----------------------------------------------------------------------------
# Fused Pallas kernel: all GAT layers + ReLU + mean-pool + Linear + LogSoftmax
# ----------------------------------------------------------------------------
def fused_gat_forward_kernel(*refs, num_layers, hidden, aux_width):
    n_fixed = 7
    (x_ref, adj_ref, colmask_ref, pvec_ref, pool_ref, fcw_ref, fcb_ref) = refs[:n_fixed]
    layer_refs = refs[n_fixed:n_fixed + 4 * num_layers]
    aux_ref, logp_ref = refs[n_fixed + 4 * num_layers:]

    H = NUM_HEADS
    n_nodes = x_ref.shape[0]

    x = x_ref[...]                                # (N, F_in); stays VMEM-resident across layers
    # additive attention mask: 0 on edges (adj[dst,src]==1, self-loops included),
    # -1e30 elsewhere; computed ONCE, applied as a vadd per head/layer.
    adj_bias = (adj_ref[...] - 1.0) * 1e30        # (N, N)
    colmask = colmask_ref[...]                    # (H, hidden): 1s on head-h's column block
    pv = pvec_ref[...]                            # (1, hidden): TopKPooling weight
    # p / ||p||, hoisted once; rsqrt goes to the EUP slot, reduction stays 2-D (1,1).
    pvn = pv * lax.rsqrt(jnp.sum(pv * pv, axis=-1, keepdims=True))

    xpre_list = []
    score_list = []
    for l in range(num_layers):                   # unrolled at trace time
        w_ref, adst_ref, asrcT_ref, bias_ref = layer_refs[4 * l:4 * l + 4]

        xp = jnp.dot(x, w_ref[...], preferred_element_type=jnp.float32)              # (N, hidden)
        # per-head attention coefficients (two tiny dots; orientations chosen so no
        # transpose is needed when broadcasting into the (N,N) logits)
        alpha_dst = jnp.dot(xp, adst_ref[...], preferred_element_type=jnp.float32)   # (N, H)
        alpha_srcT = lax.dot_general(asrcT_ref[...], xp, (((1,), (1,)), ((), ())),
                                     preferred_element_type=jnp.float32)             # (H, N)

        out = jnp.zeros((n_nodes, hidden), jnp.float32)
        for h in range(H):
            # e[i, j] = LeakyReLU(alpha_dst[i] + alpha_src[j]); softmax over sources j
            e = alpha_dst[:, h:h + 1] + alpha_srcT[h:h + 1, :]      # (N, N)
            e = jnp.where(e > 0, e, 0.2 * e) + adj_bias             # LeakyReLU(0.2) + mask bias
            m = jnp.max(e, axis=-1, keepdims=True)                  # finite (self-loop in row)
            p = jnp.exp(e - m)                                      # masked entries -> exactly 0
            denom = jnp.sum(p, axis=-1, keepdims=True)              # (N, 1), >= 1
            xh = xp * colmask[h:h + 1, :]                           # only head-h columns nonzero
            # deferred normalization: scale the (N,hidden) matmul result, not the (N,N) matrix
            out = out + pl.reciprocal(denom, approx=True) * jnp.dot(
                p, xh, preferred_element_type=jnp.float32)
        out = out + bias_ref[...]                                   # (N, hidden), pre-activation

        # TopKPooling score on the GATConv output (before ReLU): tanh((x @ p) / ||p||)
        xpre_list.append(out)
        score_list.append(jnp.tanh(jnp.sum(out * pvn, axis=-1, keepdims=True)))

        x = jnp.maximum(out, 0.0)          # ReLU(inplace=True); Dropout(0.5) = identity (eval)

    # readout fused into the tail: global_mean_pool -> Linear -> LogSoftmax
    pooled = jnp.dot(pool_ref[...], x, preferred_element_type=jnp.float32)            # (G, hidden)
    logits = jnp.dot(pooled, fcw_ref[...], preferred_element_type=jnp.float32) + fcb_ref[...]
    z = logits - jnp.max(logits, axis=-1, keepdims=True)
    logp_ref[...] = z - jnp.log(jnp.sum(jnp.exp(z), axis=-1, keepdims=True))

    # lane-dense aux slab: [xpre_0 | xpre_1 | ... | score_0 | score_1 | ... | zero pad]
    used = num_layers * hidden + num_layers
    pieces = xpre_list + score_list
    if aux_width > used:
        pieces.append(jnp.zeros((n_nodes, aux_width - used), jnp.float32))
    aux_ref[...] = jnp.concatenate(pieces, axis=-1)                 # single (N, 128) store


# ----------------------------------------------------------------------------
# pallas_call wrapper
# ----------------------------------------------------------------------------
def _full_spec(shape):
    # whole-array block (block_shape == array shape satisfies the (8,128) rule)
    nd = len(shape)
    return pl.BlockSpec(shape, lambda i, _nd=nd: (0,) * _nd)


def fused_forward(x, adj, pool_mat, params):
    N = x.shape[0]
    fc_w, fc_b = params["fc_w"], params["fc_b"]
    hidden, n_classes = fc_w.shape
    G = pool_mat.shape[0]
    layers = params["gat_layers"]
    L = len(layers)
    used = L * hidden + L
    aux_width = ((used + 127) // 128) * 128          # pad aux slab to a 128-lane multiple

    ins = (x, adj, params["colmask"], params["topk_p"], pool_mat, fc_w, fc_b)
    ins = ins + tuple(t for layer in layers for t in layer)

    kern = functools.partial(fused_gat_forward_kernel,
                             num_layers=L, hidden=hidden, aux_width=aux_width)
    aux, logp = pl.pallas_call(
        kern,
        grid=(1,),   # everything fits easily in VMEM at this size; tile dst rows for large N
        in_specs=[_full_spec(a.shape) for a in ins],
        out_specs=(_full_spec((N, aux_width)), _full_spec((G, n_classes))),
        out_shape=(jax.ShapeDtypeStruct((N, aux_width), jnp.float32),
                   jax.ShapeDtypeStruct((G, n_classes), jnp.float32)),
        compiler_params=pltpu.CompilerParams(dimension_semantics=("arbitrary",)),
    )(*ins)
    return aux, logp


@jax.jit
def forward(x, adj, pool_mat, params):
    aux, logp = fused_forward(x, adj, pool_mat, params)
    L = len(params["gat_layers"])
    hidden = params["fc_w"].shape[0]
    node_features = [aux[:, l * hidden:(l + 1) * hidden] for l in range(L)]
    topk_scores = [aux[:, L * hidden + l: L * hidden + l + 1] for l in range(L)]
    return logp, node_features, topk_scores


# ----------------------------------------------------------------------------
# pure-JAX reference (for correctness check)
# ----------------------------------------------------------------------------
def gat_ref(x, w, att_dst, att_src, bias, adj):
    N = x.shape[0]
    H, Fh = att_dst.shape
    xp = x @ w
    xph = xp.reshape(N, H, Fh)
    a_dst = jnp.einsum('nhf,hf->nh', xph, att_dst)
    a_src = jnp.einsum('nhf,hf->nh', xph, att_src)
    e = a_dst[:, None, :] + a_src[None, :, :]            # (dst, src, H)
    e = jnp.where(e > 0, e, 0.2 * e)
    mask = adj[:, :, None] > 0.5
    e = jnp.where(mask, e, -1e30)
    m = jnp.max(e, axis=1, keepdims=True)
    p = jnp.where(mask, jnp.exp(e - m), 0.0)
    att = p / jnp.sum(p, axis=1, keepdims=True)
    return jnp.einsum('nmh,mhf->nhf', att, xph).reshape(N, H * Fh) + bias


def forward_ref(x, adj, pool_mat, gat_raw, topk_p, fc_w, fc_b):
    feats, scores = [], []
    pnorm = jnp.sqrt(jnp.sum(topk_p ** 2))
    for (w, a_dst, a_src, bias) in gat_raw:
        xpre = gat_ref(x, w, a_dst, a_src, bias, adj)
        feats.append(xpre)
        scores.append(jnp.tanh(jnp.sum(xpre * topk_p, axis=-1, keepdims=True) / pnorm))
        x = jnp.maximum(xpre, 0.0)
    pooled = pool_mat @ x
    logits = pooled @ fc_w + fc_b
    return jax.nn.log_softmax(logits, axis=-1), feats, scores


# ----------------------------------------------------------------------------
# main
# ----------------------------------------------------------------------------
if __name__ == "__main__":
    # args: feat_dim=8, dim=8 (heads=4 -> hidden=32), num_layers=2, n_classes=4
    feat_dim, dim, heads, num_layers, n_classes = 8, 8, NUM_HEADS, 2, 4
    hidden = dim * heads
    nodes_per_graph, num_graphs = 8, 2
    N = nodes_per_graph * num_graphs

    key = jax.random.PRNGKey(0)

    def glorot(k, shape):
        scale = jnp.sqrt(2.0 / (shape[0] + shape[1]))
        return (scale * jax.random.normal(k, shape)).astype(jnp.float32)

    # --- deterministic parameter init (shapes follow GATConv / Linear / TopKPooling) ---
    gat_raw = []        # (W, att_dst (H,Fh), att_src (H,Fh), bias (hidden,))
    gat_layers = []     # kernel-ready: (W, adst_mat (hidden,H), asrcT_mat (H,hidden), bias (1,hidden))
    in_dims = [feat_dim] + [hidden] * (num_layers - 1)
    for f_in in in_dims:
        key, k1, k2, k3, k4 = jax.random.split(key, 5)
        w = glorot(k1, (f_in, hidden))
        att_dst = glorot(k2, (heads, dim))
        att_src = glorot(k3, (heads, dim))
        bias = (0.1 * jax.random.normal(k4, (hidden,))).astype(jnp.float32)

        adst_mat = jnp.zeros((hidden, heads), jnp.float32)
        asrcT_mat = jnp.zeros((heads, hidden), jnp.float32)
        for h in range(heads):
            adst_mat = adst_mat.at[h * dim:(h + 1) * dim, h].set(att_dst[h])
            asrcT_mat = asrcT_mat.at[h, h * dim:(h + 1) * dim].set(att_src[h])

        gat_raw.append((w, att_dst, att_src, bias))
        gat_layers.append((w, adst_mat, asrcT_mat, bias.reshape(1, hidden)))

    key, kp, kw, kx = jax.random.split(key, 4)
    topk_p = glorot(kp, (1, hidden))                         # TopKPooling weight (lane-dense row)
    fc_w = glorot(kw, (hidden, n_classes))
    fc_b = jnp.zeros((1, n_classes), jnp.float32)
    colmask = jnp.repeat(jnp.eye(heads, dtype=jnp.float32), dim, axis=1)   # (H, hidden)

    params = {"gat_layers": gat_layers, "topk_p": topk_p, "fc_w": fc_w,
              "fc_b": fc_b, "colmask": colmask}

    # --- deterministic graph: 2 graphs, bidirectional ring of 8 nodes each ---
    x = jax.random.normal(kx, (N, feat_dim), dtype=jnp.float32)
    src, dst = [], []
    for g in range(num_graphs):
        base = g * nodes_per_graph
        for i in range(nodes_per_graph):
            a, b = base + i, base + (i + 1) % nodes_per_graph
            src += [a, b]
            dst += [b, a]
    edge_index = jnp.array([src, dst], dtype=jnp.int32)              # (2, E), PyG convention

    adj = jnp.zeros((N, N), jnp.float32)
    adj = adj.at[edge_index[1], edge_index[0]].set(1.0)              # adj[dst, src] = 1
    # add_self_loops=True: load-bearing (guarantees finite row max / nonzero softmax denom)
    adj = jnp.maximum(adj, jnp.eye(N, dtype=jnp.float32))

    batch = jnp.repeat(jnp.arange(num_graphs, dtype=jnp.int32), nodes_per_graph)
    onehot = (batch[None, :] == jnp.arange(num_graphs)[:, None]).astype(jnp.float32)
    pool_mat = onehot / jnp.sum(onehot, axis=1, keepdims=True)       # global_mean_pool matrix

    # --- run the fused Pallas kernel ---
    logp, node_features, topk_scores = forward(x, adj, pool_mat, params)
    logp = jax.block_until_ready(logp)

    # --- correctness check against pure-JAX reference ---
    logp_ref, feats_ref, scores_ref = forward_ref(x, adj, pool_mat, gat_raw,
                                                  topk_p, fc_w, fc_b)
    assert logp.shape == (num_graphs, n_classes)
    # The approximate (EUP) reciprocal used for the deferred softmax normalization
    # introduces small per-layer deviations vs the exact pure-JAX reference.
    tol = dict(atol=2e-2, rtol=2e-2)
    assert bool(jnp.allclose(logp, logp_ref, **tol)), "logp mismatch vs reference"
    for got, ref in zip(node_features, feats_ref):
        assert got.shape == ref.shape
        assert bool(jnp.allclose(got, ref, **tol)), "node-feature mismatch vs reference"
    for got, ref in zip(topk_scores, scores_ref):
        assert got.shape == ref.shape
        assert bool(jnp.allclose(got, ref, **tol)), "topk score mismatch vs reference"

    print("KERNEL_OK")
</pallas_src>

<mosaic_0001>
module attributes {stable_mosaic.version = 11 : i64} {
  func.func @fused_gat_forward_kernel(%arg0: i32, %arg1: memref<16x8xf32, #tpu.memory_space<vmem>>, %arg2: memref<16x16xf32, #tpu.memory_space<vmem>>, %arg3: memref<4x32xf32, #tpu.memory_space<vmem>>, %arg4: memref<1x32xf32, #tpu.memory_space<vmem>>, %arg5: memref<2x16xf32, #tpu.memory_space<vmem>>, %arg6: memref<32x4xf32, #tpu.memory_space<vmem>>, %arg7: memref<1x4xf32, #tpu.memory_space<vmem>>, %arg8: memref<8x32xf32, #tpu.memory_space<vmem>>, %arg9: memref<32x4xf32, #tpu.memory_space<vmem>>, %arg10: memref<4x32xf32, #tpu.memory_space<vmem>>, %arg11: memref<1x32xf32, #tpu.memory_space<vmem>>, %arg12: memref<32x32xf32, #tpu.memory_space<vmem>>, %arg13: memref<32x4xf32, #tpu.memory_space<vmem>>, %arg14: memref<4x32xf32, #tpu.memory_space<vmem>>, %arg15: memref<1x32xf32, #tpu.memory_space<vmem>>, %arg16: memref<16x128xf32, #tpu.memory_space<vmem>>, %arg17: memref<2x4xf32, #tpu.memory_space<vmem>>) attributes {dimension_semantics = [#tpu.dimension_semantics<arbitrary>], iteration_bounds = array<i64: 1>, scalar_prefetch = 0 : i64, scratch_operands = 0 : i64, tpu.core_type = #tpu.core_type<tc>, window_params = [{pipeline_mode = #tpu.pipeline_mode<synchronous>, transform_indices = @transform_0, window_bounds = array<i64: 16, 8>}, {pipeline_mode = #tpu.pipeline_mode<synchronous>, transform_indices = @transform_1, window_bounds = array<i64: 16, 16>}, {pipeline_mode = #tpu.pipeline_mode<synchronous>, transform_indices = @transform_2, window_bounds = array<i64: 4, 32>}, {pipeline_mode = #tpu.pipeline_mode<synchronous>, transform_indices = @transform_3, window_bounds = array<i64: 1, 32>}, {pipeline_mode = #tpu.pipeline_mode<synchronous>, transform_indices = @transform_4, window_bounds = array<i64: 2, 16>}, {pipeline_mode = #tpu.pipeline_mode<synchronous>, transform_indices = @transform_5, window_bounds = array<i64: 32, 4>}, {pipeline_mode = #tpu.pipeline_mode<synchronous>, transform_indices = @transform_6, window_bounds = array<i64: 1, 4>}, {pipeline_mode = #tpu.pipeline_mode<synchronous>, transform_indices = @transform_7, window_bounds = array<i64: 8, 32>}, {pipeline_mode = #tpu.pipeline_mode<synchronous>, transform_indices = @transform_8, window_bounds = array<i64: 32, 4>}, {pipeline_mode = #tpu.pipeline_mode<synchronous>, transform_indices = @transform_9, window_bounds = array<i64: 4, 32>}, {pipeline_mode = #tpu.pipeline_mode<synchronous>, transform_indices = @transform_10, window_bounds = array<i64: 1, 32>}, {pipeline_mode = #tpu.pipeline_mode<synchronous>, transform_indices = @transform_11, window_bounds = array<i64: 32, 32>}, {pipeline_mode = #tpu.pipeline_mode<synchronous>, transform_indices = @transform_12, window_bounds = array<i64: 32, 4>}, {pipeline_mode = #tpu.pipeline_mode<synchronous>, transform_indices = @transform_13, window_bounds = array<i64: 4, 32>}, {pipeline_mode = #tpu.pipeline_mode<synchronous>, transform_indices = @transform_14, window_bounds = array<i64: 1, 32>}, {pipeline_mode = #tpu.pipeline_mode<synchronous>, transform_indices = @transform_15, window_bounds = array<i64: 16, 128>}, {pipeline_mode = #tpu.pipeline_mode<synchronous>, transform_indices = @transform_16, window_bounds = array<i64: 2, 4>}]} {
    %c0 = arith.constant 0 : index
    %c0_0 = arith.constant 0 : index
    %0 = vector.load %arg1[%c0, %c0_0] : memref<16x8xf32, #tpu.memory_space<vmem>>, vector<16x8xf32>
    %c0_1 = arith.constant 0 : index
    %c0_2 = arith.constant 0 : index
    %1 = vector.load %arg2[%c0_1, %c0_2] : memref<16x16xf32, #tpu.memory_space<vmem>>, vector<16x16xf32>
    %cst = arith.constant 1.000000e+00 : f32
    %2 = vector.broadcast %cst : f32 to vector<16x16xf32>
    %3 = arith.subf %1, %2 : vector<16x16xf32>
    %cst_3 = arith.constant 1.000000e+30 : f32
    %4 = vector.broadcast %cst_3 : f32 to vector<16x16xf32>
    %5 = arith.mulf %3, %4 : vector<16x16xf32>
    %c0_4 = arith.constant 0 : index
    %c0_5 = arith.constant 0 : index
    %6 = vector.load %arg3[%c0_4, %c0_5] : memref<4x32xf32, #tpu.memory_space<vmem>>, vector<4x32xf32>
    %c0_6 = arith.constant 0 : index
    %c0_7 = arith.constant 0 : index
    %7 = vector.load %arg4[%c0_6, %c0_7] : memref<1x32xf32, #tpu.memory_space<vmem>>, vector<1x32xf32>
    %8 = arith.mulf %7, %7 : vector<1x32xf32>
    %cst_8 = arith.constant dense<0.000000e+00> : vector<1xf32>
    %9 = vector.multi_reduction <add>, %8, %cst_8 [1] : vector<1x32xf32> to vector<1xf32>
    %10 = vector.shape_cast %9 : vector<1xf32> to vector<1x1xf32>
    %11 = math.rsqrt %10 : vector<1x1xf32>
    %12 = vector.broadcast %11 : vector<1x1xf32> to vector<1x32xf32>
    %13 = arith.mulf %7, %12 : vector<1x32xf32>
    %c0_9 = arith.constant 0 : index
    %c0_10 = arith.constant 0 : index
    %14 = vector.load %arg8[%c0_9, %c0_10] : memref<8x32xf32, #tpu.memory_space<vmem>>, vector<8x32xf32>
    %cst_11 = arith.constant dense<0.000000e+00> : vector<16x32xf32>
    %15 = tpu.matmul %0, %14, %cst_11 {dimension_numbers = #tpu.dot_dimension_numbers<[1], [0], [0], [1], [0, 0, 1, 1], [], []>} : vector<16x8xf32>, vector<8x32xf32>, vector<16x32xf32> -> vector<16x32xf32>
    %c0_12 = arith.constant 0 : index
    %c0_13 = arith.constant 0 : index
    %16 = vector.load %arg9[%c0_12, %c0_13] : memref<32x4xf32, #tpu.memory_space<vmem>>, vector<32x4xf32>
    %cst_14 = arith.constant dense<0.000000e+00> : vector<16x4xf32>
    %17 = tpu.matmul %15, %16, %cst_14 {dimension_numbers = #tpu.dot_dimension_numbers<[1], [0], [0], [1], [0, 0, 1, 1], [], []>} : vector<16x32xf32>, vector<32x4xf32>, vector<16x4xf32> -> vector<16x4xf32>
    %c0_15 = arith.constant 0 : index
    %c0_16 = arith.constant 0 : index
    %18 = vector.load %arg10[%c0_15, %c0_16] : memref<4x32xf32, #tpu.memory_space<vmem>>, vector<4x32xf32>
    %cst_17 = arith.constant dense<0.000000e+00> : vector<4x16xf32>
    %19 = tpu.matmul %18, %15, %cst_17 {dimension_numbers = #tpu.dot_dimension_numbers<[1], [1], [0], [0], [0, 0, 1, 0], [], []>} : vector<4x32xf32>, vector<16x32xf32>, vector<4x16xf32> -> vector<4x16xf32>
    %cst_18 = arith.constant 0.000000e+00 : f32
    %20 = vector.broadcast %cst_18 : f32 to vector<16x32xf32>
    %21 = vector.extract_strided_slice %17 {offsets = [0, 0], sizes = [16, 1], strides = [1, 1]} : vector<16x4xf32> to vector<16x1xf32>
    %22 = vector.extract_strided_slice %19 {offsets = [0, 0], sizes = [1, 16], strides = [1, 1]} : vector<4x16xf32> to vector<1x16xf32>
    %23 = vector.broadcast %21 : vector<16x1xf32> to vector<16x16xf32>
    %24 = vector.broadcast %22 : vector<1x16xf32> to vector<16x16xf32>
    %25 = arith.addf %23, %24 : vector<16x16xf32>
    %cst_19 = arith.constant 0.000000e+00 : f32
    %26 = vector.broadcast %cst_19 : f32 to vector<16x16xf32>
    %27 = arith.cmpf ogt, %25, %26 : vector<16x16xf32>
    %cst_20 = arith.constant 2.000000e-01 : f32
    %28 = vector.broadcast %cst_20 : f32 to vector<16x16xf32>
    %29 = arith.mulf %28, %25 : vector<16x16xf32>
    %30 = arith.select %27, %25, %29 : vector<16x16xi1>, vector<16x16xf32>
    %31 = arith.addf %30, %5 : vector<16x16xf32>
    %cst_21 = arith.constant dense<0xFF800000> : vector<16xf32>
    %32 = vector.multi_reduction <maximumf>, %31, %cst_21 [1] : vector<16x16xf32> to vector<16xf32>
    %33 = vector.shape_cast %32 : vector<16xf32> to vector<16x1xf32>
    %34 = vector.broadcast %33 : vector<16x1xf32> to vector<16x16xf32>
    %35 = arith.subf %31, %34 : vector<16x16xf32>
    %36 = math.exp %35 : vector<16x16xf32>
    %cst_22 = arith.constant dense<0.000000e+00> : vector<16xf32>
    %37 = vector.multi_reduction <add>, %36, %cst_22 [1] : vector<16x16xf32> to vector<16xf32>
    %38 = vector.shape_cast %37 : vector<16xf32> to vector<16x1xf32>
    %39 = vector.extract_strided_slice %6 {offsets = [0, 0], sizes = [1, 32], strides = [1, 1]} : vector<4x32xf32> to vector<1x32xf32>
    %40 = vector.broadcast %39 : vector<1x32xf32> to vector<16x32xf32>
    %41 = arith.mulf %15, %40 : vector<16x32xf32>
    %42 = tpu.reciprocal %38 {approx = true} : vector<16x1xf32> -> vector<16x1xf32>
    %cst_23 = arith.constant dense<0.000000e+00> : vector<16x32xf32>
    %43 = tpu.matmul %36, %41, %cst_23 {dimension_numbers = #tpu.dot_dimension_numbers<[1], [0], [0], [1], [0, 0, 1, 1], [], []>} : vector<16x16xf32>, vector<16x32xf32>, vector<16x32xf32> -> vector<16x32xf32>
    %44 = vector.broadcast %42 : vector<16x1xf32> to vector<16x32xf32>
    %45 = arith.mulf %44, %43 : vector<16x32xf32>
    %46 = arith.addf %20, %45 : vector<16x32xf32>
    %47 = vector.extract_strided_slice %17 {offsets = [0, 1], sizes = [16, 1], strides = [1, 1]} : vector<16x4xf32> to vector<16x1xf32>
    %48 = vector.extract_strided_slice %19 {offsets = [1, 0], sizes = [1, 16], strides = [1, 1]} : vector<4x16xf32> to vector<1x16xf32>
    %49 = vector.broadcast %47 : vector<16x1xf32> to vector<16x16xf32>
    %50 = vector.broadcast %48 : vector<1x16xf32> to vector<16x16xf32>
    %51 = arith.addf %49, %50 : vector<16x16xf32>
    %cst_24 = arith.constant 0.000000e+00 : f32
    %52 = vector.broadcast %cst_24 : f32 to vector<16x16xf32>
    %53 = arith.cmpf ogt, %51, %52 : vector<16x16xf32>
    %cst_25 = arith.constant 2.000000e-01 : f32
    %54 = vector.broadcast %cst_25 : f32 to vector<16x16xf32>
    %55 = arith.mulf %54, %51 : vector<16x16xf32>
    %56 = arith.select %53, %51, %55 : vector<16x16xi1>, vector<16x16xf32>
    %57 = arith.addf %56, %5 : vector<16x16xf32>
    %cst_26 = arith.constant dense<0xFF800000> : vector<16xf32>
    %58 = vector.multi_reduction <maximumf>, %57, %cst_26 [1] : vector<16x16xf32> to vector<16xf32>
    %59 = vector.shape_cast %58 : vector<16xf32> to vector<16x1xf32>
    %60 = vector.broadcast %59 : vector<16x1xf32> to vector<16x16xf32>
    %61 = arith.subf %57, %60 : vector<16x16xf32>
    %62 = math.exp %61 : vector<16x16xf32>
    %cst_27 = arith.constant dense<0.000000e+00> : vector<16xf32>
    %63 = vector.multi_reduction <add>, %62, %cst_27 [1] : vector<16x16xf32> to vector<16xf32>
    %64 = vector.shape_cast %63 : vector<16xf32> to vector<16x1xf32>
    %65 = vector.extract_strided_slice %6 {offsets = [1, 0], sizes = [1, 32], strides = [1, 1]} : vector<4x32xf32> to vector<1x32xf32>
    %66 = vector.broadcast %65 : vector<1x32xf32> to vector<16x32xf32>
    %67 = arith.mulf %15, %66 : vector<16x32xf32>
    %68 = tpu.reciprocal %64 {approx = true} : vector<16x1xf32> -> vector<16x1xf32>
    %cst_28 = arith.constant dense<0.000000e+00> : vector<16x32xf32>
    %69 = tpu.matmul %62, %67, %cst_28 {dimension_numbers = #tpu.dot_dimension_numbers<[1], [0], [0], [1], [0, 0, 1, 1], [], []>} : vector<16x16xf32>, vector<16x32xf32>, vector<16x32xf32> -> vector<16x32xf32>
    %70 = vector.broadcast %68 : vector<16x1xf32> to vector<16x32xf32>
    %71 = arith.mulf %70, %69 : vector<16x32xf32>
    %72 = arith.addf %46, %71 : vector<16x32xf32>
    %73 = vector.extract_strided_slice %17 {offsets = [0, 2], sizes = [16, 1], strides = [1, 1]} : vector<16x4xf32> to vector<16x1xf32>
    %74 = vector.extract_strided_slice %19 {offsets = [2, 0], sizes = [1, 16], strides = [1, 1]} : vector<4x16xf32> to vector<1x16xf32>
    %75 = vector.broadcast %73 : vector<16x1xf32> to vector<16x16xf32>
    %76 = vector.broadcast %74 : vector<1x16xf32> to vector<16x16xf32>
    %77 = arith.addf %75, %76 : vector<16x16xf32>
    %cst_29 = arith.constant 0.000000e+00 : f32
    %78 = vector.broadcast %cst_29 : f32 to vector<16x16xf32>
    %79 = arith.cmpf ogt, %77, %78 : vector<16x16xf32>
    %cst_30 = arith.constant 2.000000e-01 : f32
    %80 = vector.broadcast %cst_30 : f32 to vector<16x16xf32>
    %81 = arith.mulf %80, %77 : vector<16x16xf32>
    %82 = arith.select %79, %77, %81 : vector<16x16xi1>, vector<16x16xf32>
    %83 = arith.addf %82, %5 : vector<16x16xf32>
    %cst_31 = arith.constant dense<0xFF800000> : vector<16xf32>
    %84 = vector.multi_reduction <maximumf>, %83, %cst_31 [1] : vector<16x16xf32> to vector<16xf32>
    %85 = vector.shape_cast %84 : vector<16xf32> to vector<16x1xf32>
    %86 = vector.broadcast %85 : vector<16x1xf32> to vector<16x16xf32>
    %87 = arith.subf %83, %86 : vector<16x16xf32>
    %88 = math.exp %87 : vector<16x16xf32>
    %cst_32 = arith.constant dense<0.000000e+00> : vector<16xf32>
    %89 = vector.multi_reduction <add>, %88, %cst_32 [1] : vector<16x16xf32> to vector<16xf32>
    %90 = vector.shape_cast %89 : vector<16xf32> to vector<16x1xf32>
    %91 = vector.extract_strided_slice %6 {offsets = [2, 0], sizes = [1, 32], strides = [1, 1]} : vector<4x32xf32> to vector<1x32xf32>
    %92 = vector.broadcast %91 : vector<1x32xf32> to vector<16x32xf32>
    %93 = arith.mulf %15, %92 : vector<16x32xf32>
    %94 = tpu.reciprocal %90 {approx = true} : vector<16x1xf32> -> vector<16x1xf32>
    %cst_33 = arith.constant dense<0.000000e+00> : vector<16x32xf32>
    %95 = tpu.matmul %88, %93, %cst_33 {dimension_numbers = #tpu.dot_dimension_numbers<[1], [0], [0], [1], [0, 0, 1, 1], [], []>} : vector<16x16xf32>, vector<16x32xf32>, vector<16x32xf32> -> vector<16x32xf32>
    %96 = vector.broadcast %94 : vector<16x1xf32> to vector<16x32xf32>
    %97 = arith.mulf %96, %95 : vector<16x32xf32>
    %98 = arith.addf %72, %97 : vector<16x32xf32>
    %99 = vector.extract_strided_slice %17 {offsets = [0, 3], sizes = [16, 1], strides = [1, 1]} : vector<16x4xf32> to vector<16x1xf32>
    %100 = vector.extract_strided_slice %19 {offsets = [3, 0], sizes = [1, 16], strides = [1, 1]} : vector<4x16xf32> to vector<1x16xf32>
    %101 = vector.broadcast %99 : vector<16x1xf32> to vector<16x16xf32>
    %102 = vector.broadcast %100 : vector<1x16xf32> to vector<16x16xf32>
    %103 = arith.addf %101, %102 : vector<16x16xf32>
    %cst_34 = arith.constant 0.000000e+00 : f32
    %104 = vector.broadcast %cst_34 : f32 to vector<16x16xf32>
    %105 = arith.cmpf ogt, %103, %104 : vector<16x16xf32>
    %cst_35 = arith.constant 2.000000e-01 : f32
    %106 = vector.broadcast %cst_35 : f32 to vector<16x16xf32>
    %107 = arith.mulf %106, %103 : vector<16x16xf32>
    %108 = arith.select %105, %103, %107 : vector<16x16xi1>, vector<16x16xf32>
    %109 = arith.addf %108, %5 : vector<16x16xf32>
    %cst_36 = arith.constant dense<0xFF800000> : vector<16xf32>
    %110 = vector.multi_reduction <maximumf>, %109, %cst_36 [1] : vector<16x16xf32> to vector<16xf32>
    %111 = vector.shape_cast %110 : vector<16xf32> to vector<16x1xf32>
    %112 = vector.broadcast %111 : vector<16x1xf32> to vector<16x16xf32>
    %113 = arith.subf %109, %112 : vector<16x16xf32>
    %114 = math.exp %113 : vector<16x16xf32>
    %cst_37 = arith.constant dense<0.000000e+00> : vector<16xf32>
    %115 = vector.multi_reduction <add>, %114, %cst_37 [1] : vector<16x16xf32> to vector<16xf32>
    %116 = vector.shape_cast %115 : vector<16xf32> to vector<16x1xf32>
    %117 = vector.extract_strided_slice %6 {offsets = [3, 0], sizes = [1, 32], strides = [1, 1]} : vector<4x32xf32> to vector<1x32xf32>
    %118 = vector.broadcast %117 : vector<1x32xf32> to vector<16x32xf32>
    %119 = arith.mulf %15, %118 : vector<16x32xf32>
    %120 = tpu.reciprocal %116 {approx = true} : vector<16x1xf32> -> vector<16x1xf32>
    %cst_38 = arith.constant dense<0.000000e+00> : vector<16x32xf32>
    %121 = tpu.matmul %114, %119, %cst_38 {dimension_numbers = #tpu.dot_dimension_numbers<[1], [0], [0], [1], [0, 0, 1, 1], [], []>} : vector<16x16xf32>, vector<16x32xf32>, vector<16x32xf32> -> vector<16x32xf32>
    %122 = vector.broadcast %120 : vector<16x1xf32> to vector<16x32xf32>
    %123 = arith.mulf %122, %121 : vector<16x32xf32>
    %124 = arith.addf %98, %123 : vector<16x32xf32>
    %c0_39 = arith.constant 0 : index
    %c0_40 = arith.constant 0 : index
    %125 = vector.load %arg11[%c0_39, %c0_40] : memref<1x32xf32, #tpu.memory_space<vmem>>, vector<1x32xf32>
    %126 = vector.broadcast %125 : vector<1x32xf32> to vector<16x32xf32>
    %127 = arith.addf %124, %126 : vector<16x32xf32>
    %128 = vector.broadcast %13 : vector<1x32xf32> to vector<16x32xf32>
    %129 = arith.mulf %127, %128 : vector<16x32xf32>
    %cst_41 = arith.constant dense<0.000000e+00> : vector<16xf32>
    %130 = vector.multi_reduction <add>, %129, %cst_41 [1] : vector<16x32xf32> to vector<16xf32>
    %131 = vector.shape_cast %130 : vector<16xf32> to vector<16x1xf32>
    %132 = math.tanh %131 : vector<16x1xf32>
    %cst_42 = arith.constant 0.000000e+00 : f32
    %133 = vector.broadcast %cst_42 : f32 to vector<16x32xf32>
    %134 = arith.maximumf %127, %133 : vector<16x32xf32>
    %c0_43 = arith.constant 0 : index
    %c0_44 = arith.constant 0 : index
    %135 = vector.load %arg12[%c0_43, %c0_44] : memref<32x32xf32, #tpu.memory_space<vmem>>, vector<32x32xf32>
    %cst_45 = arith.constant dense<0.000000e+00> : vector<16x32xf32>
    %136 = tpu.matmul %134, %135, %cst_45 {dimension_numbers = #tpu.dot_dimension_numbers<[1], [0], [0], [1], [0, 0, 1, 1], [], []>} : vector<16x32xf32>, vector<32x32xf32>, vector<16x32xf32> -> vector<16x32xf32>
    %c0_46 = arith.constant 0 : index
    %c0_47 = arith.constant 0 : index
    %137 = vector.load %arg13[%c0_46, %c0_47] : memref<32x4xf32, #tpu.memory_space<vmem>>, vector<32x4xf32>
    %cst_48 = arith.constant dense<0.000000e+00> : vector<16x4xf32>
    %138 = tpu.matmul %136, %137, %cst_48 {dimension_numbers = #tpu.dot_dimension_numbers<[1], [0], [0], [1], [0, 0, 1, 1], [], []>} : vector<16x32xf32>, vector<32x4xf32>, vector<16x4xf32> -> vector<16x4xf32>
    %c0_49 = arith.constant 0 : index
    %c0_50 = arith.constant 0 : index
    %139 = vector.load %arg14[%c0_49, %c0_50] : memref<4x32xf32, #tpu.memory_space<vmem>>, vector<4x32xf32>
    %cst_51 = arith.constant dense<0.000000e+00> : vector<4x16xf32>
    %140 = tpu.matmul %139, %136, %cst_51 {dimension_numbers = #tpu.dot_dimension_numbers<[1], [1], [0], [0], [0, 0, 1, 0], [], []>} : vector<4x32xf32>, vector<16x32xf32>, vector<4x16xf32> -> vector<4x16xf32>
    %cst_52 = arith.constant 0.000000e+00 : f32
    %141 = vector.broadcast %cst_52 : f32 to vector<16x32xf32>
    %142 = vector.extract_strided_slice %138 {offsets = [0, 0], sizes = [16, 1], strides = [1, 1]} : vector<16x4xf32> to vector<16x1xf32>
    %143 = vector.extract_strided_slice %140 {offsets = [0, 0], sizes = [1, 16], strides = [1, 1]} : vector<4x16xf32> to vector<1x16xf32>
    %144 = vector.broadcast %142 : vector<16x1xf32> to vector<16x16xf32>
    %145 = vector.broadcast %143 : vector<1x16xf32> to vector<16x16xf32>
    %146 = arith.addf %144, %145 : vector<16x16xf32>
    %cst_53 = arith.constant 0.000000e+00 : f32
    %147 = vector.broadcast %cst_53 : f32 to vector<16x16xf32>
    %148 = arith.cmpf ogt, %146, %147 : vector<16x16xf32>
    %cst_54 = arith.constant 2.000000e-01 : f32
    %149 = vector.broadcast %cst_54 : f32 to vector<16x16xf32>
    %150 = arith.mulf %149, %146 : vector<16x16xf32>
    %151 = arith.select %148, %146, %150 : vector<16x16xi1>, vector<16x16xf32>
    %152 = arith.addf %151, %5 : vector<16x16xf32>
    %cst_55 = arith.constant dense<0xFF800000> : vector<16xf32>
    %153 = vector.multi_reduction <maximumf>, %152, %cst_55 [1] : vector<16x16xf32> to vector<16xf32>
    %154 = vector.shape_cast %153 : vector<16xf32> to vector<16x1xf32>
    %155 = vector.broadcast %154 : vector<16x1xf32> to vector<16x16xf32>
    %156 = arith.subf %152, %155 : vector<16x16xf32>
    %157 = math.exp %156 : vector<16x16xf32>
    %cst_56 = arith.constant dense<0.000000e+00> : vector<16xf32>
    %158 = vector.multi_reduction <add>, %157, %cst_56 [1] : vector<16x16xf32> to vector<16xf32>
    %159 = vector.shape_cast %158 : vector<16xf32> to vector<16x1xf32>
    %160 = vector.extract_strided_slice %6 {offsets = [0, 0], sizes = [1, 32], strides = [1, 1]} : vector<4x32xf32> to vector<1x32xf32>
    %161 = vector.broadcast %160 : vector<1x32xf32> to vector<16x32xf32>
    %162 = arith.mulf %136, %161 : vector<16x32xf32>
    %163 = tpu.reciprocal %159 {approx = true} : vector<16x1xf32> -> vector<16x1xf32>
    %cst_57 = arith.constant dense<0.000000e+00> : vector<16x32xf32>
    %164 = tpu.matmul %157, %162, %cst_57 {dimension_numbers = #tpu.dot_dimension_numbers<[1], [0], [0], [1], [0, 0, 1, 1], [], []>} : vector<16x16xf32>, vector<16x32xf32>, vector<16x32xf32> -> vector<16x32xf32>
    %165 = vector.broadcast %163 : vector<16x1xf32> to vector<16x32xf32>
    %166 = arith.mulf %165, %164 : vector<16x32xf32>
    %167 = arith.addf %141, %166 : vector<16x32xf32>
    %168 = vector.extract_strided_slice %138 {offsets = [0, 1], sizes = [16, 1], strides = [1, 1]} : vector<16x4xf32> to vector<16x1xf32>
    %169 = vector.extract_strided_slice %140 {offsets = [1, 0], sizes = [1, 16], strides = [1, 1]} : vector<4x16xf32> to vector<1x16xf32>
    %170 = vector.broadcast %168 : vector<16x1xf32> to vector<16x16xf32>
    %171 = vector.broadcast %169 : vector<1x16xf32> to vector<16x16xf32>
    %172 = arith.addf %170, %171 : vector<16x16xf32>
    %cst_58 = arith.constant 0.000000e+00 : f32
    %173 = vector.broadcast %cst_58 : f32 to vector<16x16xf32>
    %174 = arith.cmpf ogt, %172, %173 : vector<16x16xf32>
    %cst_59 = arith.constant 2.000000e-01 : f32
    %175 = vector.broadcast %cst_59 : f32 to vector<16x16xf32>
    %176 = arith.mulf %175, %172 : vector<16x16xf32>
    %177 = arith.select %174, %172, %176 : vector<16x16xi1>, vector<16x16xf32>
    %178 = arith.addf %177, %5 : vector<16x16xf32>
    %cst_60 = arith.constant dense<0xFF800000> : vector<16xf32>
    %179 = vector.multi_reduction <maximumf>, %178, %cst_60 [1] : vector<16x16xf32> to vector<16xf32>
    %180 = vector.shape_cast %179 : vector<16xf32> to vector<16x1xf32>
    %181 = vector.broadcast %180 : vector<16x1xf32> to vector<16x16xf32>
    %182 = arith.subf %178, %181 : vector<16x16xf32>
    %183 = math.exp %182 : vector<16x16xf32>
    %cst_61 = arith.constant dense<0.000000e+00> : vector<16xf32>
    %184 = vector.multi_reduction <add>, %183, %cst_61 [1] : vector<16x16xf32> to vector<16xf32>
    %185 = vector.shape_cast %184 : vector<16xf32> to vector<16x1xf32>
    %186 = vector.extract_strided_slice %6 {offsets = [1, 0], sizes = [1, 32], strides = [1, 1]} : vector<4x32xf32> to vector<1x32xf32>
    %187 = vector.broadcast %186 : vector<1x32xf32> to vector<16x32xf32>
    %188 = arith.mulf %136, %187 : vector<16x32xf32>
    %189 = tpu.reciprocal %185 {approx = true} : vector<16x1xf32> -> vector<16x1xf32>
    %cst_62 = arith.constant dense<0.000000e+00> : vector<16x32xf32>
    %190 = tpu.matmul %183, %188, %cst_62 {dimension_numbers = #tpu.dot_dimension_numbers<[1], [0], [0], [1], [0, 0, 1, 1], [], []>} : vector<16x16xf32>, vector<16x32xf32>, vector<16x32xf32> -> vector<16x32xf32>
    %191 = vector.broadcast %189 : vector<16x1xf32> to vector<16x32xf32>
    %192 = arith.mulf %191, %190 : vector<16x32xf32>
    %193 = arith.addf %167, %192 : vector<16x32xf32>
    %194 = vector.extract_strided_slice %138 {offsets = [0, 2], sizes = [16, 1], strides = [1, 1]} : vector<16x4xf32> to vector<16x1xf32>
    %195 = vector.extract_strided_slice %140 {offsets = [2, 0], sizes = [1, 16], strides = [1, 1]} : vector<4x16xf32> to vector<1x16xf32>
    %196 = vector.broadcast %194 : vector<16x1xf32> to vector<16x16xf32>
    %197 = vector.broadcast %195 : vector<1x16xf32> to vector<16x16xf32>
    %198 = arith.addf %196, %197 : vector<16x16xf32>
    %cst_63 = arith.constant 0.000000e+00 : f32
    %199 = vector.broadcast %cst_63 : f32 to vector<16x16xf32>
    %200 = arith.cmpf ogt, %198, %199 : vector<16x16xf32>
    %cst_64 = arith.constant 2.000000e-01 : f32
    %201 = vector.broadcast %cst_64 : f32 to vector<16x16xf32>
    %202 = arith.mulf %201, %198 : vector<16x16xf32>
    %203 = arith.select %200, %198, %202 : vector<16x16xi1>, vector<16x16xf32>
    %204 = arith.addf %203, %5 : vector<16x16xf32>
    %cst_65 = arith.constant dense<0xFF800000> : vector<16xf32>
    %205 = vector.multi_reduction <maximumf>, %204, %cst_65 [1] : vector<16x16xf32> to vector<16xf32>
    %206 = vector.shape_cast %205 : vector<16xf32> to vector<16x1xf32>
    %207 = vector.broadcast %206 : vector<16x1xf32> to vector<16x16xf32>
    %208 = arith.subf %204, %207 : vector<16x16xf32>
    %209 = math.exp %208 : vector<16x16xf32>
    %cst_66 = arith.constant dense<0.000000e+00> : vector<16xf32>
    %210 = vector.multi_reduction <add>, %209, %cst_66 [1] : vector<16x16xf32> to vector<16xf32>
    %211 = vector.shape_cast %210 : vector<16xf32> to vector<16x1xf32>
    %212 = vector.extract_strided_slice %6 {offsets = [2, 0], sizes = [1, 32], strides = [1, 1]} : vector<4x32xf32> to vector<1x32xf32>
    %213 = vector.broadcast %212 : vector<1x32xf32> to vector<16x32xf32>
    %214 = arith.mulf %136, %213 : vector<16x32xf32>
    %215 = tpu.reciprocal %211 {approx = true} : vector<16x1xf32> -> vector<16x1xf32>
    %cst_67 = arith.constant dense<0.000000e+00> : vector<16x32xf32>
    %216 = tpu.matmul %209, %214, %cst_67 {dimension_numbers = #tpu.dot_dimension_numbers<[1], [0], [0], [1], [0, 0, 1, 1], [], []>} : vector<16x16xf32>, vector<16x32xf32>, vector<16x32xf32> -> vector<16x32xf32>
    %217 = vector.broadcast %215 : vector<16x1xf32> to vector<16x32xf32>
    %218 = arith.mulf %217, %216 : vector<16x32xf32>
    %219 = arith.addf %193, %218 : vector<16x32xf32>
    %220 = vector.extract_strided_slice %138 {offsets = [0, 3], sizes = [16, 1], strides = [1, 1]} : vector<16x4xf32> to vector<16x1xf32>
    %221 = vector.extract_strided_slice %140 {offsets = [3, 0], sizes = [1, 16], strides = [1, 1]} : vector<4x16xf32> to vector<1x16xf32>
    %222 = vector.broadcast %220 : vector<16x1xf32> to vector<16x16xf32>
    %223 = vector.broadcast %221 : vector<1x16xf32> to vector<16x16xf32>
    %224 = arith.addf %222, %223 : vector<16x16xf32>
    %cst_68 = arith.constant 0.000000e+00 : f32
    %225 = vector.broadcast %cst_68 : f32 to vector<16x16xf32>
    %226 = arith.cmpf ogt, %224, %225 : vector<16x16xf32>
    %cst_69 = arith.constant 2.000000e-01 : f32
    %227 = vector.broadcast %cst_69 : f32 to vector<16x16xf32>
    %228 = arith.mulf %227, %224 : vector<16x16xf32>
    %229 = arith.select %226, %224, %228 : vector<16x16xi1>, vector<16x16xf32>
    %230 = arith.addf %229, %5 : vector<16x16xf32>
    %cst_70 = arith.constant dense<0xFF800000> : vector<16xf32>
    %231 = vector.multi_reduction <maximumf>, %230, %cst_70 [1] : vector<16x16xf32> to vector<16xf32>
    %232 = vector.shape_cast %231 : vector<16xf32> to vector<16x1xf32>
    %233 = vector.broadcast %232 : vector<16x1xf32> to vector<16x16xf32>
    %234 = arith.subf %230, %233 : vector<16x16xf32>
    %235 = math.exp %234 : vector<16x16xf32>
    %cst_71 = arith.constant dense<0.000000e+00> : vector<16xf32>
    %236 = vector.multi_reduction <add>, %235, %cst_71 [1] : vector<16x16xf32> to vector<16xf32>
    %237 = vector.shape_cast %236 : vector<16xf32> to vector<16x1xf32>
    %238 = vector.extract_strided_slice %6 {offsets = [3, 0], sizes = [1, 32], strides = [1, 1]} : vector<4x32xf32> to vector<1x32xf32>
    %239 = vector.broadcast %238 : vector<1x32xf32> to vector<16x32xf32>
    %240 = arith.mulf %136, %239 : vector<16x32xf32>
    %241 = tpu.reciprocal %237 {approx = true} : vector<16x1xf32> -> vector<16x1xf32>
    %cst_72 = arith.constant dense<0.000000e+00> : vector<16x32xf32>
    %242 = tpu.matmul %235, %240, %cst_72 {dimension_numbers = #tpu.dot_dimension_numbers<[1], [0], [0], [1], [0, 0, 1, 1], [], []>} : vector<16x16xf32>, vector<16x32xf32>, vector<16x32xf32> -> vector<16x32xf32>
    %243 = vector.broadcast %241 : vector<16x1xf32> to vector<16x32xf32>
    %244 = arith.mulf %243, %242 : vector<16x32xf32>
    %245 = arith.addf %219, %244 : vector<16x32xf32>
    %c0_73 = arith.constant 0 : index
    %c0_74 = arith.constant 0 : index
    %246 = vector.load %arg15[%c0_73, %c0_74] : memref<1x32xf32, #tpu.memory_space<vmem>>, vector<1x32xf32>
    %247 = vector.broadcast %246 : vector<1x32xf32> to vector<16x32xf32>
    %248 = arith.addf %245, %247 : vector<16x32xf32>
    %249 = vector.broadcast %13 : vector<1x32xf32> to vector<16x32xf32>
    %250 = arith.mulf %248, %249 : vector<16x32xf32>
    %cst_75 = arith.constant dense<0.000000e+00> : vector<16xf32>
    %251 = vector.multi_reduction <add>, %250, %cst_75 [1] : vector<16x32xf32> to vector<16xf32>
    %252 = vector.shape_cast %251 : vector<16xf32> to vector<16x1xf32>
    %253 = math.tanh %252 : vector<16x1xf32>
    %cst_76 = arith.constant 0.000000e+00 : f32
    %254 = vector.broadcast %cst_76 : f32 to vector<16x32xf32>
    %255 = arith.maximumf %248, %254 : vector<16x32xf32>
    %c0_77 = arith.constant 0 : index
    %c0_78 = arith.constant 0 : index
    %256 = vector.load %arg5[%c0_77, %c0_78] : memref<2x16xf32, #tpu.memory_space<vmem>>, vector<2x16xf32>
    %cst_79 = arith.constant dense<0.000000e+00> : vector<2x32xf32>
    %257 = tpu.matmul %256, %255, %cst_79 {dimension_numbers = #tpu.dot_dimension_numbers<[1], [0], [0], [1], [0, 0, 1, 1], [], []>} : vector<2x16xf32>, vector<16x32xf32>, vector<2x32xf32> -> vector<2x32xf32>
    %c0_80 = arith.constant 0 : index
    %c0_81 = arith.constant 0 : index
    %258 = vector.load %arg6[%c0_80, %c0_81] : memref<32x4xf32, #tpu.memory_space<vmem>>, vector<32x4xf32>
    %cst_82 = arith.constant dense<0.000000e+00> : vector<2x4xf32>
    %259 = tpu.matmul %257, %258, %cst_82 {dimension_numbers = #tpu.dot_dimension_numbers<[1], [0], [0], [1], [0, 0, 1, 1], [], []>} : vector<2x32xf32>, vector<32x4xf32>, vector<2x4xf32> -> vector<2x4xf32>
    %c0_83 = arith.constant 0 : index
    %c0_84 = arith.constant 0 : index
    %260 = vector.load %arg7[%c0_83, %c0_84] : memref<1x4xf32, #tpu.memory_space<vmem>>, vector<1x4xf32>
    %261 = vector.broadcast %260 : vector<1x4xf32> to vector<2x4xf32>
    %262 = arith.addf %259, %261 : vector<2x4xf32>
    %cst_85 = arith.constant dense<0xFF800000> : vector<2xf32>
    %263 = vector.multi_reduction <maximumf>, %262, %cst_85 [1] : vector<2x4xf32> to vector<2xf32>
    %264 = vector.shape_cast %263 : vector<2xf32> to vector<2x1xf32>
    %265 = vector.broadcast %264 : vector<2x1xf32> to vector<2x4xf32>
    %266 = arith.subf %262, %265 : vector<2x4xf32>
    %267 = math.exp %266 : vector<2x4xf32>
    %cst_86 = arith.constant dense<0.000000e+00> : vector<2xf32>
    %268 = vector.multi_reduction <add>, %267, %cst_86 [1] : vector<2x4xf32> to vector<2xf32>
    %269 = vector.shape_cast %268 : vector<2xf32> to vector<2x1xf32>
    %270 = math.log %269 : vector<2x1xf32>
    %271 = vector.broadcast %270 : vector<2x1xf32> to vector<2x4xf32>
    %272 = arith.subf %266, %271 : vector<2x4xf32>
    %c0_87 = arith.constant 0 : index
    %c0_88 = arith.constant 0 : index
    %273 = vector.load %arg17[%c0_87, %c0_88] : memref<2x4xf32, #tpu.memory_space<vmem>>, vector<2x4xf32>
    tpu.vector_store %arg17[%c0_87, %c0_88], %272 {strides = array<i32>} : memref<2x4xf32, #tpu.memory_space<vmem>>, vector<2x4xf32>,
    %cst_89 = arith.constant 0.000000e+00 : f32
    %274 = vector.broadcast %cst_89 : f32 to vector<16x62xf32>
    %275 = tpu.concatenate %127, %248, %132, %253, %274 in 1 : vector<16x32xf32>, vector<16x32xf32>, vector<16x1xf32>, vector<16x1xf32>, vector<16x62xf32> -> vector<16x128xf32>
    %c0_90 = arith.constant 0 : index
    %c0_91 = arith.constant 0 : index
    %276 = vector.load %arg16[%c0_90, %c0_91] : memref<16x128xf32, #tpu.memory_space<vmem>>, vector<16x128xf32>
    tpu.vector_store %arg16[%c0_90, %c0_91], %275 {strides = array<i32>} : memref<16x128xf32, #tpu.memory_space<vmem>>, vector<16x128xf32>,
    return
  }
  func.func @transform_0(%arg0: i32) -> (i32, i32) {
    %c0_i32 = arith.constant 0 : i32
    %c0_i32_0 = arith.constant 0 : i32
    %c0_i32_1 = arith.constant 0 : i32
    return %c0_i32, %c0_i32_0 : i32, i32
  }
  func.func @transform_1(%arg0: i32) -> (i32, i32) {
    %c0_i32 = arith.constant 0 : i32
    %c0_i32_0 = arith.constant 0 : i32
    %c0_i32_1 = arith.constant 0 : i32
    return %c0_i32, %c0_i32_0 : i32, i32
  }
  func.func @transform_2(%arg0: i32) -> (i32, i32) {
    %c0_i32 = arith.constant 0 : i32
    %c0_i32_0 = arith.constant 0 : i32
    %c0_i32_1 = arith.constant 0 : i32
    return %c0_i32, %c0_i32_0 : i32, i32
  }
  func.func @transform_3(%arg0: i32) -> (i32, i32) {
    %c0_i32 = arith.constant 0 : i32
    %c0_i32_0 = arith.constant 0 : i32
    %c0_i32_1 = arith.constant 0 : i32
    return %c0_i32, %c0_i32_0 : i32, i32
  }
  func.func @transform_4(%arg0: i32) -> (i32, i32) {
    %c0_i32 = arith.constant 0 : i32
    %c0_i32_0 = arith.constant 0 : i32
    %c0_i32_1 = arith.constant 0 : i32
    return %c0_i32, %c0_i32_0 : i32, i32
  }
  func.func @transform_5(%arg0: i32) -> (i32, i32) {
    %c0_i32 = arith.constant 0 : i32
    %c0_i32_0 = arith.constant 0 : i32
    %c0_i32_1 = arith.constant 0 : i32
    return %c0_i32, %c0_i32_0 : i32, i32
  }
  func.func @transform_6(%arg0: i32) -> (i32, i32) {
    %c0_i32 = arith.constant 0 : i32
    %c0_i32_0 = arith.constant 0 : i32
    %c0_i32_1 = arith.constant 0 : i32
    return %c0_i32, %c0_i32_0 : i32, i32
  }
  func.func @transform_7(%arg0: i32) -> (i32, i32) {
    %c0_i32 = arith.constant 0 : i32
    %c0_i32_0 = arith.constant 0 : i32
    %c0_i32_1 = arith.constant 0 : i32
    return %c0_i32, %c0_i32_0 : i32, i32
  }
  func.func @transform_8(%arg0: i32) -> (i32, i32) {
    %c0_i32 = arith.constant 0 : i32
    %c0_i32_0 = arith.constant 0 : i32
    %c0_i32_1 = arith.constant 0 : i32
    return %c0_i32, %c0_i32_0 : i32, i32
  }
  func.func @transform_9(%arg0: i32) -> (i32, i32) {
    %c0_i32 = arith.constant 0 : i32
    %c0_i32_0 = arith.constant 0 : i32
    %c0_i32_1 = arith.constant 0 : i32
    return %c0_i32, %c0_i32_0 : i32, i32
  }
  func.func @transform_10(%arg0: i32) -> (i32, i32) {
    %c0_i32 = arith.constant 0 : i32
    %c0_i32_0 = arith.constant 0 : i32
    %c0_i32_1 = arith.constant 0 : i32
    return %c0_i32, %c0_i32_0 : i32, i32
  }
  func.func @transform_11(%arg0: i32) -> (i32, i32) {
    %c0_i32 = arith.constant 0 : i32
    %c0_i32_0 = arith.constant 0 : i32
    %c0_i32_1 = arith.constant 0 : i32
    return %c0_i32, %c0_i32_0 : i32, i32
  }
  func.func @transform_12(%arg0: i32) -> (i32, i32) {
    %c0_i32 = arith.constant 0 : i32
    %c0_i32_0 = arith.constant 0 : i32
    %c0_i32_1 = arith.constant 0 : i32
    return %c0_i32, %c0_i32_0 : i32, i32
  }
  func.func @transform_13(%arg0: i32) -> (i32, i32) {
    %c0_i32 = arith.constant 0 : i32
    %c0_i32_0 = arith.constant 0 : i32
    %c0_i32_1 = arith.constant 0 : i32
    return %c0_i32, %c0_i32_0 : i32, i32
  }
  func.func @transform_14(%arg0: i32) -> (i32, i32) {
    %c0_i32 = arith.constant 0 : i32
    %c0_i32_0 = arith.constant 0 : i32
    %c0_i32_1 = arith.constant 0 : i32
    return %c0_i32, %c0_i32_0 : i32, i32
  }
  func.func @transform_15(%arg0: i32) -> (i32, i32) {
    %c0_i32 = arith.constant 0 : i32
    %c0_i32_0 = arith.constant 0 : i32
    %c0_i32_1 = arith.constant 0 : i32
    return %c0_i32, %c0_i32_0 : i32, i32
  }
  func.func @transform_16(%arg0: i32) -> (i32, i32) {
    %c0_i32 = arith.constant 0 : i32
    %c0_i32_0 = arith.constant 0 : i32
    %c0_i32_1 = arith.constant 0 : i32
    return %c0_i32, %c0_i32_0 : i32, i32
  }
}

</mosaic_0001>

<bundles_post_ra>
// kernel: forward.1
= control target key start
LH: loop header
LB: loop body
LE: loop exit
PB: predicated region body
PF: predicated region fallthrough
CT: control target
= control target key end

     0   :  { %s2699_s0 = inlined_call_operand.vmem [shape: f32[16,8], index: 0, kind: input, shape index: {}]   ;;  %s2700_s1 = inlined_call_operand.vmem [shape: f32[16,16], index: 1, kind: input, shape index: {}]   ;;  %s2701_s2 = inlined_call_operand.vmem [shape: f32[4,32], index: 2, kind: input, shape index: {}]   ;;  %s2702_s3 = inlined_call_operand.vmem [shape: f32[1,32], index: 3, kind: input, shape index: {}]   ;;  %s2703_s4 = inlined_call_operand.vmem [shape: f32[2,16], index: 4, kind: input, shape index: {}]   ;;  %s2704_s5 = inlined_call_operand.vmem [shape: f32[32,4], index: 5, kind: input, shape index: {}]   ;;  %s2705_s6 = inlined_call_operand.vmem [shape: f32[1,4], index: 6, kind: input, shape index: {}]   ;;  %s2706_s7 = inlined_call_operand.vmem [shape: f32[8,32], index: 7, kind: input, shape index: {}]   ;;  %s2707_s8 = inlined_call_operand.vmem [shape: f32[32,4], index: 8, kind: input, shape index: {}]   ;;  %s2708_s9 = inlined_call_operand.vmem [shape: f32[4,32], index: 9, kind: input, shape index: {}]   ;;  %s2709_s10 = inlined_call_operand.vmem [shape: f32[1,32], index: 10, kind: input, shape index: {}]   ;;  %s2710_s11 = inlined_call_operand.vmem [shape: f32[32,32], index: 11, kind: input, shape index: {}]   ;;  %s2711_s12 = inlined_call_operand.vmem [shape: f32[32,4], index: 12, kind: input, shape index: {}]   ;;  %s2712_s13 = inlined_call_operand.vmem [shape: f32[4,32], index: 13, kind: input, shape index: {}]   ;;  %s2713_s14 = inlined_call_operand.vmem [shape: f32[1,32], index: 14, kind: input, shape index: {}]   ;;  %s2714_s15 = inlined_call_operand.vmem [shape: f32[16,128], index: 15, kind: output, shape index: {0}]   ;;  %s2715_s16 = inlined_call_operand.hbm [shape: f32[2,4], index: 16, kind: output, shape index: {1}]  }
   0x1   :  { %2717 = sst [smem:[#allocation5_spill]] %s2699_s0 }
   0x2   :  { %v70_v0 = vld [vmem:[%s2706_s7] sm:$0xff]  ;;  %s2718_s25 = sld [smem:[#allocation5_spill]]  ;;  %vm71_vm0 = vcmask 64512   ;;  %v154_v4 = vld [vmem:[%s2707_s8 + $0x8] sm:$0xff]  ;;  %v155_v5 = vld [vmem:[%s2707_s8 + $0x10] sm:$0xff] }
   0x3   :  { %1973 = vmatprep.subr.mxu1 %v70_v0  ;;  %v153_v3 = vld [vmem:[%s2707_s8] sm:$0xff]  ;;  %v156_v7 = vld [vmem:[%s2707_s8 + $0x18] sm:$0xff] }
   0x4   :  { %1974 = vmatpush3.msra.mxu1 %v70_v0  ;;  %v2099_v6 = vpack.c.bf16 %v154_v4, %v153_v3 }
   0x8   :  { %v53_v1 = vld [vmem:[%s2718_s25] sm:$0xff]  ;;  %v54_v2 = vld [vmem:[%s2718_s25 + $0x8] sm:$0xff] }
   0x9   :  { %1975 = vmatprep.mubr.msk.f32.mxu1 %vm71_vm0, %v53_v1 }
   0xa   :  { %22 = vsyncpa [#allocation3], 0  ;;  %1976 = vmatmul.mubr.msk.f32.vlgmr.msra.gmra.mrb[0].mxu1 %vm71_vm0, %v54_v2  ;;  %v2103_v8 = vpack.c.bf16 %v156_v7, %v155_v5  ;;  %2100 = vmatprep.subr.bf16.mxu1 %v2099_v6  ;;  %v2298_v9 = vmov 0.0|0.0   ;;  %vm2299_vm1 = vmmov 0   ;;  %v2300_v10 = vmov 0.0   ;;  %v56_v47 = vld [vmem:[%s2700_s1 + $0x8] sm:$0xff] }
   0xb   :  { %2102 = vmatpush3.bf16.msra.mxu1 %v2099_v6  ;;  %2107 = vmatprep.subr.bf16.mxu0 %v2298_v9  ;;  %v2301_v11 = vmov 1   ;;  %v2302_v12 = vmov 0   ;;  %v323_v13 = vlaneseq  ;;  %v61_v19 = vld [vmem:[%s2701_s2] sm:$0xf]  ;;  %vm157_vm2 = vcmask 261120   ;;  %s2306_s8 = smov [#allocation2]  }
   0xc   :  { %2104 = vmatprep.subr.bf16.mxu1 %v2103_v8  ;;  %1993 = vmatprep.mubr.msk.f32.mxu0 %vm2299_vm1, %v2300_v10  ;;  %vm2443_vm3 = vmpackc.low %vm157_vm2, %vm157_vm2  ;;  %v239_v40 = vld [vmem:[%s2708_s9] sm:$0xf]  ;;  %v2303_v43 = vmov 2   ;;  %v2304_v46 = vmov 3   ;;  %v1870_v50 = vadd.f32 -1.0, %v56_v47  ;;  %vm337_vm6 = vcmask 130048  }
   0xd   :  { %2182 = vset.pattern.permute.xlu1 %v2301_v11  ;;  %2181 = vset.pattern.permute.xlu0 %v2302_v12  ;;  %v324_v14 = vshrl.u32 %v323_v13, 7  ;;  %v55_v51 = vld [vmem:[%s2700_s1] sm:$0xff]  ;;  %s1859_s20 = sshll.u32 %s2306_s8, 4  ;;  %s1860_s20 = int_to_ptr.vmem [resolvable:$true] %s1859_s20 }
   0xe   :  { %v2485_v57 = vmul.f32 1e+30, %v1870_v50  ;;  %v1869_v58 = vadd.f32 -1.0, %v55_v51  ;;  %s2274_s2 = scalar_lea.vmem %s1860_s20, 32  ;;  %p2279_p1 = scmp.lt.s32.totalorder %s1860_s20, %s1860_s20 }
   0xf   :  { %2106 = vmatpush3.bf16.msra.mxu1 %v2103_v8  ;;  %v2418_v15 = vsub.s32 0, %v324_v14  ;;  %v2420_v16 = vsub.s32 1, %v324_v14  ;;  %v2422_v17 = vsub.s32 2, %v324_v14  ;;  %v2424_v18 = vsub.s32 3, %v324_v14  ;;  %p2275_p0 = scmp.ne.s32.totalorder %s1860_s20, %s2274_s2  ;;  %p2280_p2 = scmp.lt.s32.totalorder %s2274_s2, %s2274_s2 }
  0x10   :  { %v2488_v4 = vmul.f32 1e+30, %v1869_v58 }
  0x11   :  { %v2430_v20 = vrot.slane %v61_v19, %v2418_v15  ;;  %v2433_v21 = vrot.slane %v61_v19, %v2420_v16  ;;  %v2436_v22 = vrot.slane %v61_v19, %v2422_v17  ;;  %v2439_v23 = vrot.slane %v61_v19, %v2424_v18  ;;  %p2281_p3 = por %p2280_p2, %p2279_p1 }
  0x13   :  { %p2282_p4 = pnand %p2281_p3, %p2275_p0 }
  0xdd   :  { %v1977_v24 = vpop.f32.mrb[0].mxu1 }
  0xde   :  { %v144_v25 = vpop.f32.mrb[1].mxu1  ;;  %v361_v27 = vmul.f32 %v1977_v24, %v2430_v20  ;;  %v494_v28 = vmul.f32 %v1977_v24, %v2433_v21  ;;  %v627_v29 = vmul.f32 %v1977_v24, %v2436_v22  ;;  %v760_v30 = vmul.f32 %v1977_v24, %v2439_v23 }
  0xdf   :  { %1986 = vmatprep.mubr.msk.f32.mxu1 %vm157_vm2, %v144_v25  ;;  %v2108_v31 = vpack.c.bf16 %v1977_v24, %v144_v25  ;;  %v360_v32 = vmul.f32 %v2430_v20, %v144_v25  ;;  %v493_v33 = vmul.f32 %v2433_v21, %v144_v25  ;;  %v626_v34 = vmul.f32 %v2436_v22, %v144_v25 }
  0xe0   :  { %1987 = vmatmul.mubr.msk.f32.vlgmr.msra.gmra.mrb[2].mxu1 %vm157_vm2, %v1977_v24  ;;  %v759_v35 = vmul.f32 %v2439_v23, %v144_v25 }
  0xe1   :  { %2110 = vmatpush3.bf16.xpose.msk.msra.mxu0 %vm2443_vm3, %v2108_v31  ;;  %v2111_v36 = vpack.c.bf16 %v361_v27, %v360_v32  ;;  %v2115_v37 = vpack.c.bf16 %v494_v28, %v493_v33  ;;  %v2459_v38 = vpack.c.bf16 %v627_v29, %v626_v34 }
  0xe2   :  { %v2461_v39 = vpack.c.bf16 %v760_v30, %v759_v35 }
  0xe3   :  { %2112 = vmatprep.subr.bf16.mxu1 %v2111_v36  ;;  %2116 = vmatprep.subr.bf16.mxu0 %v2115_v37 }
  0xe4   :  { %2114 = vmatpush3.bf16.msra.mxu1 %v2111_v36 }
  0xe5   :  { %2120 = vmatprep.subr.bf16.mxu1 %v2459_v38 }
  0xe8   :  { %1994 = vmatmul.mubr.msk.f32.vlgmr.msra.gmra.mrb[0].mxu0 %vm157_vm2, %v239_v40 }
  0xe9   :  { %2118 = vmatpush3.bf16.msra.mxu0 %v2115_v37 }
  0xea   :  { %2124 = vmatprep.subr.bf16.mxu0 %v2461_v39 }
 0x1b3   :  { %v1988_v41 = vpop.f32.mrb[2].mxu1 }
 0x1b4   :  { %454 = vperm.xlu1 %2182, %v1988_v41   ;;  %320 = vperm.xlu0 %2181, %v1988_v41   ;;  %v230_v42 = vpop.f32.mrb[3].mxu1 }
 0x1b8   :  { %2183 = vset.pattern.permute.xlu1 %v2303_v43  ;;  %315 = vperm.xlu0 %2181, %v230_v42  }
 0x1b9   :  { %587 = vperm.xlu1 %2183, %v1988_v41  }
 0x1bb   :  { %v309_v44 = vpop.f32.mrb[0].mxu0 }
 0x1bc   :  { %2185 = vset.pattern.permute.xlu0 %v2303_v43  ;;  %v1995_v45 = vpop.f32.mrb[1].mxu0  ;;  %v460_v48 = vrot.slane %v309_v44, %v2420_v16  ;;  %v326_v49 = vrot.slane %v309_v44, %v2418_v15  ;;  %v593_v56 = vrot.slane %v309_v44, %v2422_v17  ;;  %v726_v34 = vrot.slane %v309_v44, %v2424_v18 }
 0x1bd   :  { %2184 = vset.pattern.permute.xlu1 %v2301_v11  ;;  %583 = vperm.xlu0 %2185, %v230_v42  }
 0x1be   :  { %450 = vperm.xlu1 %2184, %v230_v42  }
 0x1c1   :  { %2187 = vset.pattern.permute.xlu0 %v2304_v46 }
 0x1c2   :  { %2186 = vset.pattern.permute.xlu1 %v2304_v46  ;;  %720 = vperm.xlu0 %2187, %v1988_v41  }
 0x1c3   :  { %716 = vperm.xlu1 %2186, %v230_v42  }
 0x1c6   :  { %2188 = vset.pattern.permute.xlu0 %v2302_v12 }
 0x1c7   :  { %2189 = vset.pattern.permute.xlu1 %v2301_v11 }
 0x233   :  { %v455_v52 = vpop.permute.xlu1 %454  ;;  %v321_v53 = vpop.permute.xlu0 %320 }
 0x234   :  { %v462_v54 = vadd.f32 %v460_v48, %v455_v52  ;;  %v328_v55 = vadd.f32 %v326_v49, %v321_v53 }
 0x236   :  { %vm464_vm4 = vcmp.gt.f32.partialorder %v462_v54, 0.0  ;;  %v466_v59 = vmul.f32 0.2, %v462_v54  ;;  %vm330_vm5 = vcmp.gt.f32.partialorder %v328_v55, 0.0  ;;  %v332_v60 = vmul.f32 0.2, %v328_v55 }
 0x237   :  { %v316_v61 = vpop.permute.xlu0 %315 }
 0x238   :  { %v327_v62 = vadd.f32 %v326_v49, %v316_v61  ;;  %v588_v63 = vpop.permute.xlu1 %587  ;;  %v334_v0 = vsel %vm330_vm5, %v328_v55, %v332_v60  ;;  %v468_v1 = vsel %vm464_vm4, %v462_v54, %v466_v59 }
 0x239   :  { %v595_v2 = vadd.f32 %v593_v56, %v588_v63  ;;  %v336_v3 = vadd.f32 %v334_v0, %v2485_v57  ;;  %v470_v6 = vadd.f32 %v468_v1, %v2485_v57 }
 0x23a   :  { %vm329_vm7 = vcmp.gt.f32.partialorder %v327_v62, 0.0  ;;  %v331_v5 = vmul.f32 0.2, %v327_v62 }
 0x23b   :  { %vm597_vm8 = vcmp.gt.f32.partialorder %v595_v2, 0.0  ;;  %v599_v7 = vmul.f32 0.2, %v595_v2  ;;  %v341_v8 = vsel %vm337_vm6, %v336_v3, -inf  ;;  %v474_v29 = vsel %vm337_vm6, %v470_v6, -inf }
 0x23c   :  { %342 = vmax.xlane.f32.xlu0 %v341_v8  ;;  %v584_v13 = vpop.permute.xlu0 %583  ;;  %v333_v14 = vsel %vm329_vm7, %v327_v62, %v331_v5 }
 0x23d   :  { %v594_v19 = vadd.f32 %v593_v56, %v584_v13  ;;  %v451_v24 = vpop.permute.xlu1 %450  ;;  %v335_v25 = vadd.f32 %v333_v14, %v2488_v4  ;;  %v601_v27 = vsel %vm597_vm8, %v595_v2, %v599_v7  ;;  %vm64_vm8 = vcmask 253952  }
 0x23e   :  { %v461_v28 = vadd.f32 %v460_v48, %v451_v24  ;;  %v603_v32 = vadd.f32 %v601_v27, %v2485_v57 }
 0x23f   :  { %vm596_vm9 = vcmp.gt.f32.partialorder %v594_v19, 0.0  ;;  %v598_v30 = vmul.f32 0.2, %v594_v19  ;;  %v338_v31 = vsel %vm337_vm6, %v335_v25, -inf }
 0x240   :  { %vm463_vm10 = vcmp.gt.f32.partialorder %v461_v28, 0.0  ;;  %v465_v33 = vmul.f32 0.2, %v461_v28  ;;  %475 = vmax.xlane.f32.xlu0 %v474_v29  ;;  %339 = vmax.xlane.f32.xlu1 %v338_v31  ;;  %v607_v45 = vsel %vm337_vm6, %v603_v32, -inf }
 0x241   :  { %v721_v35 = vpop.permute.xlu0 %720  ;;  %v600_v41 = vsel %vm596_vm9, %v594_v19, %v598_v30  ;;  %vm1843_vm9 = vcmask 531456  }
 0x242   :  { %v728_v36 = vadd.f32 %v726_v34, %v721_v35  ;;  %v717_v37 = vpop.permute.xlu1 %716  ;;  %v467_v40 = vsel %vm463_vm10, %v461_v28, %v465_v33  ;;  %v602_v51 = vadd.f32 %v600_v41, %v2488_v4  ;;  %vm1846_vm10 = vcmask 539648  }
 0x243   :  { %v727_v42 = vadd.f32 %v726_v34, %v717_v37  ;;  %v469_v47 = vadd.f32 %v467_v40, %v2488_v4 }
 0x244   :  { %vm730_vm11 = vcmp.gt.f32.partialorder %v728_v36, 0.0  ;;  %v732_v48 = vmul.f32 0.2, %v728_v36  ;;  %608 = vmax.xlane.f32.xlu0 %v607_v45  ;;  %v604_v54 = vsel %vm337_vm6, %v602_v51, -inf }
 0x245   :  { %vm729_vm12 = vcmp.gt.f32.partialorder %v727_v42, 0.0  ;;  %v731_v49 = vmul.f32 0.2, %v727_v42  ;;  %v471_v50 = vsel %vm337_vm6, %v469_v47, -inf }
 0x246   :  { %472 = vmax.xlane.f32.xlu1 %v471_v50  ;;  %v734_v44 = vsel %vm730_vm11, %v728_v36, %v732_v48 }
 0x247   :  { %v736_v52 = vadd.f32 %v734_v44, %v2485_v57  ;;  %v733_v53 = vsel %vm729_vm12, %v727_v42, %v731_v49  ;;  %v875_v44 = vld [vmem:[%s2710_s11] sm:$0xff] }
 0x248   :  { %v735_v56 = vadd.f32 %v733_v53, %v2488_v4 }
 0x249   :  { %v740_v55 = vsel %vm337_vm6, %v736_v52, -inf }
 0x24a   :  { %605 = vmax.xlane.f32.xlu1 %v604_v54  ;;  %741 = vmax.xlane.f32.xlu0 %v740_v55  ;;  %v737_v58 = vsel %vm337_vm6, %v735_v56, -inf  ;;  %v877_v54 = vld [vmem:[%s2710_s11 + $0x10] sm:$0xff]  ;;  %v878_v55 = vld [vmem:[%s2710_s11 + $0x18] sm:$0xff] }
 0x24e   :  { %738 = vmax.xlane.f32.xlu1 %v737_v58  ;;  %v960_v58 = vld [vmem:[%s2711_s12] sm:$0xff] }
 0x2c9   :  { %v343_v59 = vpop.xlane.xlu0 %342 }
 0x2ca   :  { %v345_v60 = vsub.f32 %v336_v3, %v343_v59  ;;  %v961_v59 = vld [vmem:[%s2711_s12 + $0x8] sm:$0xff] }
 0x2cc   :  { %v348_v61 = vmul.f32 1.442695, %v345_v60  ;;  %v962_v60 = vld [vmem:[%s2711_s12 + $0x10] sm:$0xff] }
 0x2cd   :  { %v340_v62 = vpop.xlane.xlu1 %339  ;;  %v476_v63 = vpop.xlane.xlu0 %475 }
 0x2ce   :  { %2196 = vpow2.f32 %v348_v61  ;;  %v344_v0 = vsub.f32 %v335_v25, %v340_v62  ;;  %v478_v1 = vsub.f32 %v470_v6, %v476_v63  ;;  %v2135_v61 = vpack.c.bf16 %v961_v59, %v960_v58  ;;  %v963_v62 = vld [vmem:[%s2711_s12 + $0x18] sm:$0xff] }
 0x2cf   :  { %v2139_v63 = vpack.c.bf16 %v963_v62, %v962_v60 }
 0x2d0   :  { %v346_v2 = vmul.f32 1.442695, %v344_v0  ;;  %v481_v5 = vmul.f32 1.442695, %v478_v1 }
 0x2d1   :  { %v609_v7 = vpop.xlane.xlu0 %608 }
 0x2d2   :  { %2198 = vpow2.f32 %v346_v2  ;;  %v611_v8 = vsub.f32 %v603_v32, %v609_v7 }
 0x2d3   :  { %2200 = vpow2.f32 %v481_v5  ;;  %v473_v13 = vpop.xlane.xlu1 %472 }
 0x2d4   :  { %v477_v14 = vsub.f32 %v469_v47, %v473_v13  ;;  %v614_v24 = vmul.f32 1.442695, %v611_v8 }
 0x2d6   :  { %v479_v19 = vmul.f32 1.442695, %v477_v14 }
 0x2d7   :  { %v606_v27 = vpop.xlane.xlu1 %605  ;;  %v742_v28 = vpop.xlane.xlu0 %741 }
 0x2d8   :  { %v2197_v29 = vpop.eup %2196  ;;  %2202 = vpow2.f32 %v479_v19  ;;  %v610_v3 = vsub.f32 %v602_v51, %v606_v27  ;;  %v744_v30 = vsub.f32 %v736_v52, %v742_v28  ;;  %v876_v52 = vld [vmem:[%s2710_s11 + $0x8] sm:$0xff] }
 0x2d9   :  { %v353_v31 = vsel %vm337_vm6, %v2197_v29, 0.0  ;;  %2204 = vpow2.f32 %v614_v24  ;;  %v2127_v53 = vpack.c.bf16 %v876_v52, %v875_v44  ;;  %v1886_v44 = vld [vmem:[%s2709_s10] ss:$0 sm:$0xff] }
 0x2da   :  { %v612_v25 = vmul.f32 1.442695, %v610_v3  ;;  %354 = vadd.xlane.f32.xlu1 %v353_v31  ;;  %v747_v6 = vmul.f32 1.442695, %v744_v30 }
 0x2db   :  { %v739_v33 = vpop.xlane.xlu1 %738 }
 0x2dc   :  { %v2199_v34 = vpop.eup %2198  ;;  %2206 = vpow2.f32 %v612_v25  ;;  %v743_v32 = vsub.f32 %v735_v56, %v739_v33  ;;  %v2131_v56 = vpack.c.bf16 %v878_v55, %v877_v54 }
 0x2dd   :  { %v2201_v35 = vpop.eup %2200  ;;  %2000 = vmatprep.mubr.msk.f32.mxu1 %vm337_vm6, %v2199_v34  ;;  %v350_v36 = vsel %vm337_vm6, %v2199_v34, 0.0  ;;  %2208 = vpow2.f32 %v747_v6 }
 0x2de   :  { %v745_v37 = vmul.f32 1.442695, %v743_v32  ;;  %2001 = vmatmul.mubr.msk.f32.vlgmr.msra.gmra.mrb[4].mxu1 %vm337_vm6, %v2197_v29  ;;  %351 = vadd.xlane.f32.xlu1 %v350_v36  ;;  %v486_v40 = vsel %vm337_vm6, %v2201_v35, 0.0 }
 0x2df   :  { %2122 = vmatpush3.bf16.msra.mxu1 %v2459_v38  ;;  %487 = vadd.xlane.f32.xlu0 %v486_v40 }
 0x2e0   :  { %2210 = vpow2.f32 %v745_v37  ;;  %2128 = vmatprep.subr.bf16.mxu1 %v2127_v53 }
 0x2e2   :  { %v2203_v41 = vpop.eup %2202 }
 0x2e3   :  { %2007 = vmatprep.mubr.msk.f32.mxu0 %vm337_vm6, %v2203_v41  ;;  %v483_v42 = vsel %vm337_vm6, %v2203_v41, 0.0  ;;  %v2205_v45 = vpop.eup %2204 }
 0x2e4   :  { %2008 = vmatmul.mubr.msk.f32.vlgmr.msra.gmra.mrb[2].mxu0 %vm337_vm6, %v2201_v35  ;;  %484 = vadd.xlane.f32.xlu0 %v483_v42  ;;  %v619_v38 = vsel %vm337_vm6, %v2205_v45, 0.0 }
 0x2e5   :  { %2126 = vmatpush3.bf16.msra.mxu0 %v2461_v39 }
 0x2e6   :  { %v2207_v47 = vpop.eup %2206  ;;  %2136 = vmatprep.subr.bf16.mxu0 %v2135_v61 }
 0x2e7   :  { %2014 = vmatprep.mubr.msk.f32.mxu1 %vm337_vm6, %v2207_v47  ;;  %v616_v48 = vsel %vm337_vm6, %v2207_v47, 0.0  ;;  %v2209_v49 = vpop.eup %2208 }
 0x2e8   :  { %617 = vadd.xlane.f32.xlu1 %v616_v48  ;;  %2015 = vmatmul.mubr.msk.f32.vlgmr.msra.gmra.mrb[6].mxu1 %vm337_vm6, %v2205_v45  ;;  %v752_v39 = vsel %vm337_vm6, %v2209_v49, 0.0 }
 0x2e9   :  { %620 = vadd.xlane.f32.xlu0 %v619_v38  ;;  %2130 = vmatpush3.bf16.msra.mxu1 %v2127_v53 }
 0x2ea   :  { %v2211_v50 = vpop.eup %2210  ;;  %2132 = vmatprep.subr.bf16.mxu1 %v2131_v56 }
 0x2eb   :  { %2021 = vmatprep.mubr.msk.f32.mxu0 %vm337_vm6, %v2211_v50  ;;  %v749_v51 = vsel %vm337_vm6, %v2211_v50, 0.0 }
 0x2ec   :  { %750 = vadd.xlane.f32.xlu1 %v749_v51  ;;  %2022 = vmatmul.mubr.msk.f32.vlgmr.msra.gmra.mrb[4].mxu0 %vm337_vm6, %v2209_v49 }
 0x2ed   :  { %753 = vadd.xlane.f32.xlu0 %v752_v39  ;;  %2134 = vmatpush3.bf16.msra.mxu1 %v2131_v56 }
 0x2ee   :  { %2143 = vmatprep.subr.bf16.mxu1 %v2298_v9  ;;  %2138 = vmatpush3.bf16.msra.mxu0 %v2135_v61 }
 0x2ef   :  { %2140 = vmatprep.subr.bf16.mxu0 %v2139_v63 }
 0x2f2   :  { %2142 = vmatpush3.bf16.msra.mxu0 %v2139_v63 }
 0x367   :  { %v355_v1 = vpop.xlane.xlu1 %354 }
 0x368   :  { %2212 = vrcp.f32 %v355_v1 }
 0x36b   :  { %v352_v5 = vpop.xlane.xlu1 %351 }
 0x36c   :  { %v488_v0 = vpop.xlane.xlu0 %487  ;;  %2214 = vrcp.f32 %v352_v5 }
 0x36d   :  { %2216 = vrcp.f32 %v488_v0 }
 0x371   :  { %v485_v2 = vpop.xlane.xlu0 %484 }
 0x372   :  { %2218 = vrcp.f32 %v485_v2  ;;  %v2213_v27 = vpop.eup %2212 }
 0x375   :  { %v618_v8 = vpop.xlane.xlu1 %617 }
 0x376   :  { %v621_v7 = vpop.xlane.xlu0 %620  ;;  %v2215_v28 = vpop.eup %2214 }
 0x377   :  { %2220 = vrcp.f32 %v621_v7  ;;  %v2217_v29 = vpop.eup %2216 }
 0x378   :  { %2222 = vrcp.f32 %v618_v8 }
 0x379   :  { %v751_v24 = vpop.xlane.xlu1 %750 }
 0x37a   :  { %v754_v14 = vpop.xlane.xlu0 %753 }
 0x37b   :  { %2224 = vrcp.f32 %v754_v14 }
 0x37c   :  { %2226 = vrcp.f32 %v751_v24  ;;  %v2219_v30 = vpop.eup %2218 }
 0x381   :  { %v2221_v35 = vpop.eup %2220 }
 0x382   :  { %v2223_v40 = vpop.eup %2222 }
 0x385   :  { %v2225_v48 = vpop.eup %2224 }
 0x386   :  { %v2227_v50 = vpop.eup %2226 }
 0x3b1   :  { %v2002_v13 = vpop.f32.mrb[4].mxu1 }
 0x3b2   :  { %v436_v19 = vpop.f32.mrb[5].mxu1  ;;  %v446_v31 = vmul.f32 %v2213_v27, %v2002_v13 }
 0x3b3   :  { %v445_v33 = vmul.f32 %v2215_v28, %v436_v19 }
 0x3b7   :  { %v2009_v3 = vpop.f32.mrb[2].mxu0 }
 0x3b8   :  { %v579_v25 = vmul.f32 %v2217_v29, %v2009_v3  ;;  %v569_v6 = vpop.f32.mrb[3].mxu0 }
 0x3b9   :  { %v578_v34 = vmul.f32 %v2219_v30, %v569_v6 }
 0x3ba   :  { %v581_v32 = vadd.f32 %v579_v25, %v446_v31 }
 0x3bb   :  { %v580_v36 = vadd.f32 %v578_v34, %v445_v33  ;;  %v2016_v37 = vpop.f32.mrb[6].mxu1 }
 0x3bc   :  { %v712_v41 = vmul.f32 %v2221_v35, %v2016_v37  ;;  %v702_v42 = vpop.f32.mrb[7].mxu1 }
 0x3bd   :  { %v711_v45 = vmul.f32 %v2223_v40, %v702_v42 }
 0x3be   :  { %v714_v47 = vadd.f32 %v712_v41, %v581_v32 }
 0x3bf   :  { %v713_v38 = vadd.f32 %v711_v45, %v580_v36  ;;  %v2023_v49 = vpop.f32.mrb[4].mxu0 }
 0x3c0   :  { %v845_v51 = vmul.f32 %v2225_v48, %v2023_v49  ;;  %v835_v39 = vpop.f32.mrb[5].mxu0 }
 0x3c1   :  { %v844_v52 = vmul.f32 %v2227_v50, %v835_v39 }
 0x3c2   :  { %v847_v53 = vadd.f32 %v845_v51, %v714_v47 }
 0x3c3   :  { %v846_v54 = vadd.f32 %v844_v52, %v713_v38 }
 0x3c4   :  { %v2552_v55 = vadd.f32 %v1886_v44, %v847_v53 }
 0x3c5   :  { %v2554_v56 = vadd.f32 %v1886_v44, %v846_v54 }
 0x3c6   :  { %v874_v59 = vmax.f32 %v2552_v55, 0.0 }
 0x3c7   :  { %v873_v58 = vmax.f32 %v2554_v56, 0.0 }
 0x3c9   :  { %2032 = vmatprep.mubr.msk.f32.mxu1 %vm157_vm2, %v873_v58 }
 0x3ca   :  { %2033 = vmatmul.mubr.msk.f32.vlgmr.msra.gmra.mrb[8].mxu1 %vm157_vm2, %v874_v59 }
 0x3cb   :  { %2050 = vmatprep.mubr.msk.f32.mxu1 %vm2299_vm1, %v2300_v10 }
 0x49d   :  { %v2034_v60 = vpop.f32.mrb[8].mxu1 }
 0x49e   :  { %v951_v61 = vpop.f32.mrb[9].mxu1  ;;  %v1162_v62 = vmul.f32 %v2034_v60, %v2430_v20  ;;  %v1420_v63 = vmul.f32 %v2034_v60, %v2436_v22  ;;  %v1291_v0 = vmul.f32 %v2034_v60, %v2433_v21  ;;  %v1549_v1 = vmul.f32 %v2034_v60, %v2439_v23 }
 0x49f   :  { %v2144_v2 = vpack.c.bf16 %v2034_v60, %v951_v61  ;;  %2043 = vmatprep.mubr.msk.f32.mxu0 %vm157_vm2, %v951_v61  ;;  %v1161_v5 = vmul.f32 %v951_v61, %v2430_v20  ;;  %v1419_v7 = vmul.f32 %v951_v61, %v2436_v22  ;;  %v1290_v8 = vmul.f32 %v951_v61, %v2433_v21  ;;  %v1045_v20 = vld [vmem:[%s2712_s13] sm:$0xf] }
 0x4a0   :  { %2044 = vmatmul.mubr.msk.f32.vlgmr.msra.gmra.mrb[6].mxu0 %vm157_vm2, %v2034_v60  ;;  %v1548_v13 = vmul.f32 %v951_v61, %v2439_v23 }
 0x4a1   :  { %2146 = vmatpush3.bf16.xpose.msk.msra.mxu1 %vm2443_vm3, %v2144_v2  ;;  %v2147_v14 = vpack.c.bf16 %v1162_v62, %v1161_v5  ;;  %v2155_v19 = vpack.c.bf16 %v1420_v63, %v1419_v7  ;;  %v2574_v24 = vpack.c.bf16 %v1291_v0, %v1290_v8 }
 0x4a2   :  { %v2576_v27 = vpack.c.bf16 %v1549_v1, %v1548_v13 }
 0x4a3   :  { %2148 = vmatprep.subr.bf16.mxu0 %v2147_v14  ;;  %2156 = vmatprep.subr.bf16.mxu1 %v2155_v19 }
 0x4a4   :  { %2150 = vmatpush3.bf16.msra.mxu0 %v2147_v14 }
 0x4a5   :  { %2152 = vmatprep.subr.bf16.mxu0 %v2574_v24 }
 0x4a8   :  { %2051 = vmatmul.mubr.msk.f32.vlgmr.msra.gmra.mrb[10].mxu1 %vm157_vm2, %v1045_v20 }
 0x4a9   :  { %2158 = vmatpush3.bf16.msra.mxu1 %v2155_v19 }
 0x4aa   :  { %2163 = vmatprep.subr.bf16.mxu1 %v2298_v9 }
 0x573   :  { %v2045_v21 = vpop.f32.mrb[6].mxu0 }
 0x574   :  { %1255 = vperm.xlu1 %2189, %v2045_v21   ;;  %1126 = vperm.xlu0 %2188, %v2045_v21   ;;  %v1036_v22 = vpop.f32.mrb[7].mxu0 }
 0x578   :  { %2190 = vset.pattern.permute.xlu1 %v2303_v43  ;;  %2195 = vset.pattern.permute.xlu0 %v2304_v46 }
 0x579   :  { %1384 = vperm.xlu1 %2190, %v2045_v21  }
 0x57b   :  { %v1115_v23 = vpop.f32.mrb[10].mxu1 }
 0x57c   :  { %v2052_v26 = vpop.f32.mrb[11].mxu1  ;;  %v1261_v28 = vrot.slane %v1115_v23, %v2420_v16  ;;  %v1132_v29 = vrot.slane %v1115_v23, %v2418_v15  ;;  %v1519_v60 = vrot.slane %v1115_v23, %v2424_v18 }
 0x57d   :  { %2191 = vset.pattern.permute.xlu1 %v2302_v12  ;;  %v1390_v12 = vrot.slane %v1115_v23, %v2422_v17 }
 0x57e   :  { %1121 = vperm.xlu1 %2191, %v1036_v22  }
 0x582   :  { %2192 = vset.pattern.permute.xlu1 %v2301_v11 }
 0x583   :  { %1251 = vperm.xlu1 %2192, %v1036_v22  }
 0x587   :  { %2193 = vset.pattern.permute.xlu1 %v2303_v43 }
 0x588   :  { %1380 = vperm.xlu1 %2193, %v1036_v22  }
 0x58c   :  { %2194 = vset.pattern.permute.xlu1 %v2304_v46 }
 0x58d   :  { %1509 = vperm.xlu1 %2194, %v1036_v22  }
 0x591   :  { %1513 = vperm.xlu1 %2194, %v2045_v21  }
 0x5f3   :  { %v1256_v3 = vpop.permute.xlu1 %1255  ;;  %v1127_v30 = vpop.permute.xlu0 %1126 }
 0x5f4   :  { %v1263_v31 = vadd.f32 %v1261_v28, %v1256_v3  ;;  %v1134_v25 = vadd.f32 %v1132_v29, %v1127_v30 }
 0x5f6   :  { %vm1265_vm13 = vcmp.gt.f32.partialorder %v1263_v31, 0.0  ;;  %v1267_v11 = vmul.f32 0.2, %v1263_v31  ;;  %vm1136_vm14 = vcmp.gt.f32.partialorder %v1134_v25, 0.0  ;;  %v1138_v6 = vmul.f32 0.2, %v1134_v25 }
 0x5f8   :  { %v1385_v43 = vpop.permute.xlu1 %1384  ;;  %v1140_v33 = vsel %vm1136_vm14, %v1134_v25, %v1138_v6  ;;  %v1269_v34 = vsel %vm1265_vm13, %v1263_v31, %v1267_v11 }
 0x5f9   :  { %v1392_v46 = vadd.f32 %v1390_v12, %v1385_v43  ;;  %v1142_v32 = vadd.f32 %v1140_v33, %v2485_v57  ;;  %v1271_v36 = vadd.f32 %v1269_v34, %v2485_v57 }
 0x5fb   :  { %vm1394_vm15 = vcmp.gt.f32.partialorder %v1392_v46, 0.0  ;;  %v1396_v16 = vmul.f32 0.2, %v1392_v46  ;;  %v1146_v35 = vsel %vm337_vm6, %v1142_v32, -inf  ;;  %v1275_v41 = vsel %vm337_vm6, %v1271_v36, -inf }
 0x5fc   :  { %1147 = vmax.xlane.f32.xlu0 %v1146_v35 }
 0x5fd   :  { %v1122_v37 = vpop.permute.xlu1 %1121  ;;  %v1398_v40 = vsel %vm1394_vm15, %v1392_v46, %v1396_v16 }
 0x5fe   :  { %v1133_v17 = vadd.f32 %v1132_v29, %v1122_v37  ;;  %v1400_v42 = vadd.f32 %v1398_v40, %v2485_v57 }
 0x600   :  { %vm1135_vm0 = vcmp.gt.f32.partialorder %v1133_v17, 0.0  ;;  %v1137_v45 = vmul.f32 0.2, %v1133_v17  ;;  %1276 = vmax.xlane.f32.xlu0 %v1275_v41  ;;  %v1404_v49 = vsel %vm337_vm6, %v1400_v42, -inf }
 0x602   :  { %v1252_v47 = vpop.permute.xlu1 %1251  ;;  %v1139_v48 = vsel %vm1135_vm0, %v1133_v17, %v1137_v45 }
 0x603   :  { %v1262_v38 = vadd.f32 %v1261_v28, %v1252_v47  ;;  %v1141_v50 = vadd.f32 %v1139_v48, %v2488_v4 }
 0x604   :  { %1405 = vmax.xlane.f32.xlu0 %v1404_v49 }
 0x605   :  { %vm1264_vm3 = vcmp.gt.f32.partialorder %v1262_v38, 0.0  ;;  %v1266_v51 = vmul.f32 0.2, %v1262_v38  ;;  %v1143_v39 = vsel %vm337_vm6, %v1141_v50, -inf }
 0x606   :  { %1144 = vmax.xlane.f32.xlu1 %v1143_v39 }
 0x607   :  { %v1381_v44 = vpop.permute.xlu1 %1380  ;;  %v1268_v52 = vsel %vm1264_vm3, %v1262_v38, %v1266_v51 }
 0x608   :  { %v1391_v53 = vadd.f32 %v1390_v12, %v1381_v44  ;;  %v1270_v54 = vadd.f32 %v1268_v52, %v2488_v4  ;;  %v62_v44 = vld [vmem:[%s2702_s3] sm:$0x1] }
 0x609   :  { %v63_v52 = vmul.f32 %v62_v44, %v62_v44 }
 0x60a   :  { %vm1393_vm4 = vcmp.gt.f32.partialorder %v1391_v53, 0.0  ;;  %v1395_v58 = vmul.f32 0.2, %v1391_v53  ;;  %v1272_v59 = vsel %vm337_vm6, %v1270_v54, -inf }
 0x60b   :  { %1273 = vmax.xlane.f32.xlu1 %v1272_v59 }
 0x60c   :  { %v1510_v61 = vpop.permute.xlu1 %1509  ;;  %v1397_v62 = vsel %vm1393_vm4, %v1391_v53, %v1395_v58 }
 0x60d   :  { %v1520_v63 = vadd.f32 %v1519_v60, %v1510_v61  ;;  %v1399_v0 = vadd.f32 %v1397_v62, %v2488_v4 }
 0x60f   :  { %vm1522_vm5 = vcmp.gt.f32.partialorder %v1520_v63, 0.0  ;;  %v1524_v1 = vmul.f32 0.2, %v1520_v63  ;;  %v1401_v2 = vsel %vm337_vm6, %v1399_v0, -inf }
 0x610   :  { %1402 = vmax.xlane.f32.xlu1 %v1401_v2  ;;  %v1514_v5 = vpop.permute.xlu1 %1513 }
 0x611   :  { %v1521_v7 = vadd.f32 %v1519_v60, %v1514_v5  ;;  %v1526_v8 = vsel %vm1522_vm5, %v1520_v63, %v1524_v1 }
 0x612   :  { %v1528_v13 = vadd.f32 %v1526_v8, %v2488_v4 }
 0x613   :  { %vm1523_vm7 = vcmp.gt.f32.partialorder %v1521_v7, 0.0  ;;  %v1525_v14 = vmul.f32 0.2, %v1521_v7 }
 0x614   :  { %v1530_v19 = vsel %vm337_vm6, %v1528_v13, -inf }
 0x615   :  { %1531 = vmax.xlane.f32.xlu1 %v1530_v19  ;;  %v1527_v18 = vsel %vm1523_vm7, %v1521_v7, %v1525_v14 }
 0x616   :  { %v1529_v20 = vadd.f32 %v1527_v18, %v2485_v57 }
 0x618   :  { %v1533_v21 = vsel %vm337_vm6, %v1529_v20, -inf }
 0x619   :  { %1534 = vmax.xlane.f32.xlu0 %v1533_v21 }
 0x689   :  { %v1148_v22 = vpop.xlane.xlu0 %1147 }
 0x68a   :  { %v1150_v23 = vsub.f32 %v1142_v32, %v1148_v22 }
 0x68c   :  { %v1153_v26 = vmul.f32 1.442695, %v1150_v23 }
 0x68d   :  { %v1277_v28 = vpop.xlane.xlu0 %1276 }
 0x68e   :  { %2228 = vpow2.f32 %v1153_v26  ;;  %v1279_v29 = vsub.f32 %v1271_v36, %v1277_v28 }
 0x690   :  { %v1282_v3 = vmul.f32 1.442695, %v1279_v29 }
 0x691   :  { %v1406_v30 = vpop.xlane.xlu0 %1405 }
 0x692   :  { %2230 = vpow2.f32 %v1282_v3  ;;  %v1408_v4 = vsub.f32 %v1400_v42, %v1406_v30 }
 0x693   :  { %v1145_v31 = vpop.xlane.xlu1 %1144 }
 0x694   :  { %v1411_v25 = vmul.f32 1.442695, %v1408_v4  ;;  %v1149_v12 = vsub.f32 %v1141_v50, %v1145_v31 }
 0x696   :  { %2232 = vpow2.f32 %v1411_v25  ;;  %v1151_v11 = vmul.f32 1.442695, %v1149_v12 }
 0x698   :  { %v2229_v6 = vpop.eup %2228  ;;  %2234 = vpow2.f32 %v1151_v11  ;;  %v1274_v57 = vpop.xlane.xlu1 %1273 }
 0x699   :  { %v1278_v43 = vsub.f32 %v1270_v54, %v1274_v57  ;;  %v1158_v33 = vsel %vm337_vm6, %v2229_v6, 0.0  ;;  %v65_v54 = vsel %vm64_vm8, %v63_v52, 0.0 }
 0x69a   :  { %1159 = vadd.xlane.f32.xlu0 %v1158_v33 }
 0x69b   :  { %v1280_v34 = vmul.f32 1.442695, %v1278_v43 }
 0x69c   :  { %v2231_v46 = vpop.eup %2230 }
 0x69d   :  { %2236 = vpow2.f32 %v1280_v34  ;;  %v1403_v32 = vpop.xlane.xlu1 %1402  ;;  %v1287_v16 = vsel %vm337_vm6, %v2231_v46, 0.0 }
 0x69e   :  { %v1407_v35 = vsub.f32 %v1399_v0, %v1403_v32  ;;  %1288 = vadd.xlane.f32.xlu0 %v1287_v16 }
 0x6a0   :  { %v2233_v36 = vpop.eup %2232  ;;  %v1409_v37 = vmul.f32 1.442695, %v1407_v35 }
 0x6a1   :  { %v1416_v40 = vsel %vm337_vm6, %v2233_v36, 0.0 }
 0x6a2   :  { %v2235_v17 = vpop.eup %2234  ;;  %2238 = vpow2.f32 %v1409_v37  ;;  %1417 = vadd.xlane.f32.xlu0 %v1416_v40  ;;  %v1532_v41 = vpop.xlane.xlu1 %1531 }
 0x6a3   :  { %v1536_v42 = vsub.f32 %v1528_v13, %v1532_v41  ;;  %2057 = vmatprep.mubr.msk.f32.mxu0 %vm337_vm6, %v2235_v17  ;;  %v1155_v45 = vsel %vm337_vm6, %v2235_v17, 0.0  ;;  %v1902_v41 = vld [vmem:[%s2713_s14] ss:$0 sm:$0xff] }
 0x6a4   :  { %2058 = vmatmul.mubr.msk.f32.vlgmr.msra.gmra.mrb[8].mxu0 %vm337_vm6, %v2229_v6  ;;  %1156 = vadd.xlane.f32.xlu1 %v1155_v45 }
 0x6a5   :  { %v1538_v47 = vmul.f32 1.442695, %v1536_v42  ;;  %2154 = vmatpush3.bf16.msra.mxu0 %v2574_v24 }
 0x6a6   :  { %2160 = vmatprep.subr.bf16.mxu0 %v2576_v27  ;;  %v1535_v48 = vpop.xlane.xlu0 %1534 }
 0x6a7   :  { %v2237_v38 = vpop.eup %2236  ;;  %2240 = vpow2.f32 %v1538_v47  ;;  %v1537_v49 = vsub.f32 %v1529_v20, %v1535_v48 }
 0x6a8   :  { %2064 = vmatprep.mubr.msk.f32.mxu0 %vm337_vm6, %v2237_v38  ;;  %v1284_v50 = vsel %vm337_vm6, %v2237_v38, 0.0 }
 0x6a9   :  { %v1540_v51 = vmul.f32 1.442695, %v1537_v49  ;;  %2065 = vmatmul.mubr.msk.f32.vlgmr.msra.gmra.mrb[10].mxu0 %vm337_vm6, %v2231_v46  ;;  %1285 = vadd.xlane.f32.xlu1 %v1284_v50 }
 0x6aa   :  { %2162 = vmatpush3.bf16.msra.mxu0 %v2576_v27 }
 0x6ab   :  { %2242 = vpow2.f32 %v1540_v51  ;;  %2166 = vmatprep.subr.bf16.mxu0 %v2298_v9 }
 0x6ac   :  { %v2239_v24 = vpop.eup %2238 }
 0x6ad   :  { %2071 = vmatprep.mubr.msk.f32.mxu1 %vm337_vm6, %v2239_v24  ;;  %v1413_v39 = vsel %vm337_vm6, %v2239_v24, 0.0 }
 0x6ae   :  { %2072 = vmatmul.mubr.msk.f32.vlgmr.msra.gmra.mrb[12].mxu1 %vm337_vm6, %v2233_v36  ;;  %1414 = vadd.xlane.f32.xlu1 %v1413_v39 }
 0x6af   :  { %2085 = vmatprep.mubr.msk.f32.mxu1 %vm2299_vm1, %v2300_v10 }
 0x6b1   :  { %v2241_v27 = vpop.eup %2240 }
 0x6b2   :  { %2078 = vmatprep.mubr.msk.f32.mxu0 %vm337_vm6, %v2241_v27  ;;  %v1542_v53 = vsel %vm337_vm6, %v2241_v27, 0.0  ;;  %v1658_v27 = vld [vmem:[%s2703_s4] sm:$0x3] }
 0x6b3   :  { %1543 = vadd.xlane.f32.xlu1 %v1542_v53  ;;  %v1732_v53 = vld [vmem:[%s2704_s5] sm:$0xff] }
 0x6b5   :  { %v2243_v58 = vpop.eup %2242 }
 0x6b6   :  { %2079 = vmatmul.mubr.msk.f32.vlgmr.msra.gmra.mrb[12].mxu0 %vm337_vm6, %v2243_v58  ;;  %v1545_v59 = vsel %vm337_vm6, %v2243_v58, 0.0  ;;  %v1734_v58 = vld [vmem:[%s2704_s5 + $0x10] sm:$0xff] }
 0x6b7   :  { %1546 = vadd.xlane.f32.xlu0 %v1545_v59  ;;  %66 = vadd.xlane.f32.xlu1 %v65_v54  ;;  %v1733_v54 = vld [vmem:[%s2704_s5 + $0x8] sm:$0xff] }
 0x6b8   :  { %2096 = vmatprep.mubr.msk.f32.mxu0 %vm2299_vm1, %v2300_v10  ;;  %v2167_v59 = vpack.c.bf16 %v1733_v54, %v1732_v53  ;;  %vm1816_vm1 = vcmask 25600  }
 0x6ba   :  { %2168 = vmatpush3.bf16.msra.mxu0 %v2167_v59 }
 0x6bb   :  { %2169 = vmatprep.subr.bf16.mxu0 %v2298_v9 }
 0x727   :  { %v1160_v10 = vpop.xlane.xlu0 %1159 }
 0x72b   :  { %v1289_v19 = vpop.xlane.xlu0 %1288 }
 0x72f   :  { %v1418_v18 = vpop.xlane.xlu0 %1417 }
 0x731   :  { %v1157_v60 = vpop.xlane.xlu1 %1156 }
 0x736   :  { %v1286_v61 = vpop.xlane.xlu1 %1285 }
 0x73b   :  { %v1415_v62 = vpop.xlane.xlu1 %1414 }
 0x740   :  { %v1544_v63 = vpop.xlane.xlu1 %1543 }
 0x744   :  { %v67_v0 = vpop.xlane.xlu1 %66  ;;  %v1547_v28 = vpop.xlane.xlu0 %1546 }
 0x745   :  { %2244 = vrsqrt.f32 %v67_v0  ;;  %v1904_v0 = vld [vmem:[%s2705_s6] ss:$0 sm:$0xff] }
 0x746   :  { %2246 = vrcp.f32 %v1157_v60  ;;  %v1735_v60 = vld [vmem:[%s2704_s5 + $0x18] sm:$0xff]  ;;  %s2305_s5 = smov 32  }
 0x747   :  { %2248 = vrcp.f32 %v1160_v10 }
 0x748   :  { %2250 = vrcp.f32 %v1289_v19 }
 0x749   :  { %2252 = vrcp.f32 %v1286_v61  ;;  %v2170_v61 = vpack.c.bf16 %v1735_v60, %v1734_v58 }
 0x74a   :  { %2254 = vrcp.f32 %v1418_v18 }
 0x74b   :  { %2256 = vrcp.f32 %v1415_v62  ;;  %2171 = vmatpush3.bf16.msra.mxu0 %v2170_v61 }
 0x74c   :  { %2258 = vrcp.f32 %v1547_v28 }
 0x74d   :  { %2260 = vrcp.f32 %v1544_v63 }
 0x74f   :  { %v2245_v1 = vpop.eup %2244 }
 0x750   :  { %v69_v2 = vmul.f32 %v2245_v1, %v62_v44 }
 0x752   :  { %v861_v5 = vrot.slane %v69_v2, %v2418_v15  ;;  %v2247_v15 = vpop.eup %2246 }
 0x753   :  { %v2249_v23 = vpop.eup %2248 }
 0x754   :  { %v864_v7 = vmul.f32 %v861_v5, %v2552_v55  ;;  %v863_v8 = vmul.f32 %v861_v5, %v2554_v56  ;;  %v2251_v26 = vpop.eup %2250 }
 0x755   :  { %v2253_v3 = vpop.eup %2252 }
 0x756   :  { %v868_v13 = vsel %vm157_vm2, %v864_v7, 0.0  ;;  %v865_v14 = vsel %vm157_vm2, %v863_v8, 0.0  ;;  %v2255_v6 = vpop.eup %2254 }
 0x757   :  { %869 = vadd.xlane.f32.xlu1 %v868_v13  ;;  %866 = vadd.xlane.f32.xlu0 %v865_v14  ;;  %v2257_v43 = vpop.eup %2256 }
 0x758   :  { %v2259_v35 = vpop.eup %2258 }
 0x759   :  { %v2261_v37 = vpop.eup %2260 }
 0x777   :  { %v2059_v20 = vpop.f32.mrb[8].mxu0 }
 0x778   :  { %v1237_v21 = vpop.f32.mrb[9].mxu0  ;;  %v1247_v30 = vmul.f32 %v2249_v23, %v2059_v20 }
 0x779   :  { %v1246_v22 = vmul.f32 %v2247_v15, %v1237_v21 }
 0x77c   :  { %v2066_v29 = vpop.f32.mrb[10].mxu0 }
 0x77d   :  { %v1376_v4 = vmul.f32 %v2251_v26, %v2066_v29  ;;  %v1366_v31 = vpop.f32.mrb[11].mxu0 }
 0x77e   :  { %v1375_v25 = vmul.f32 %v2253_v3, %v1366_v31 }
 0x77f   :  { %v1378_v12 = vadd.f32 %v1376_v4, %v1247_v30 }
 0x780   :  { %v1377_v11 = vadd.f32 %v1375_v25, %v1246_v22 }
 0x781   :  { %v2073_v57 = vpop.f32.mrb[12].mxu1 }
 0x782   :  { %v1505_v33 = vmul.f32 %v2255_v6, %v2073_v57  ;;  %v1495_v34 = vpop.f32.mrb[13].mxu1 }
 0x783   :  { %v1504_v46 = vmul.f32 %v2257_v43, %v1495_v34 }
 0x784   :  { %v1507_v32 = vadd.f32 %v1505_v33, %v1378_v12 }
 0x785   :  { %v1506_v16 = vadd.f32 %v1504_v46, %v1377_v11 }
 0x789   :  { %v2080_v36 = vpop.f32.mrb[12].mxu0 }
 0x78a   :  { %v1634_v40 = vmul.f32 %v2259_v35, %v2080_v36  ;;  %v1624_v17 = vpop.f32.mrb[13].mxu0 }
 0x78b   :  { %v1633_v42 = vmul.f32 %v2261_v37, %v1624_v17 }
 0x78c   :  { %v1636_v45 = vadd.f32 %v1634_v40, %v1507_v32 }
 0x78d   :  { %v1635_v47 = vadd.f32 %v1633_v42, %v1506_v16 }
 0x78e   :  { %v1645_v48 = vadd.f32 %v1902_v41, %v1636_v45 }
 0x78f   :  { %v1644_v38 = vadd.f32 %v1902_v41, %v1635_v47 }
 0x790   :  { %v1657_v49 = vmax.f32 %v1645_v48, 0.0  ;;  %v1647_v50 = vmul.f32 %v1645_v48, %v861_v5 }
 0x791   :  { %v1656_v51 = vmax.f32 %v1644_v38, 0.0  ;;  %v1646_v24 = vmul.f32 %v1644_v38, %v861_v5 }
 0x792   :  { %v1651_v39 = vsel %vm157_vm2, %v1647_v50, 0.0 }
 0x793   :  { %1652 = vadd.xlane.f32.xlu1 %v1651_v39  ;;  %v1648_v44 = vsel %vm157_vm2, %v1646_v24, 0.0  ;;  %v2164_v52 = vpack.c.bf16 %v1657_v49, %v1656_v51 }
 0x794   :  { %1649 = vadd.xlane.f32.xlu0 %v1648_v44 }
 0x795   :  { %2165 = vmatpush3.bf16.msra.mxu1 %v2164_v52 }
 0x798   :  { %2086 = vmatmul.mubr.msk.f32.vlgmr.msra.gmra.mrb[14].mxu1 %vm337_vm6, %v1658_v27  ;;  %vm1840_vm6 = vcmask 523264  }
 0x7e4   :  { %v867_v8 = vpop.xlane.xlu0 %866  ;;  %v870_v29 = vpop.xlane.xlu1 %869 }
 0x7e5   :  { %2262 = vtanh.f32 %v867_v8 }
 0x7ef   :  { %v2263_v18 = vpop.eup %2262 }
 0x820   :  { %v1653_v3 = vpop.xlane.xlu1 %1652 }
 0x821   :  { %v1650_v9 = vpop.xlane.xlu0 %1649 }
 0x822   :  { %2264 = vtanh.f32 %v1650_v9 }
 0x82c   :  { %v2265_v15 = vpop.eup %2264 }
 0x86b   :  { %v1728_v62 = vpop.f32.mrb[14].mxu1 }
 0x86c   :  { %v2087_v63 = vpop.f32.mrb[15].mxu1  ;;  %2097 = vmatmul.mubr.msk.f32.vlgmr.msra.gmra.mrb[14].mxu0 %vm157_vm2, %v1728_v62 }
 0x93f   :  { %v1812_v1 = vpop.f32.mrb[14].mxu0 }
 0x940   :  { %v1813_v2 = vadd.f32 %v1904_v0, %v1812_v1  ;;  %v2098_v5 = vpop.f32.mrb[15].mxu0 }
 0x942   :  { %v1817_v7 = vsel %vm1816_vm1, %v1813_v2, -inf }
 0x943   :  { %1818 = vmax.xlane.f32.xlu0 %v1817_v7 }
 0x959   :  { %1832 = vrot.lane.b32.xlu0 %v1644_v38, %s2305_s5 }
 0x9d0   :  { %v1819_v13 = vpop.xlane.xlu0 %1818 }
 0x9d1   :  { %v1820_v14 = vsub.f32 %v1813_v2, %v1819_v13 }
 0x9d3   :  { %v1821_v10 = vmul.f32 1.442695, %v1820_v14 }
 0x9d4   :  { %v1833_v19 = vpop.permute.xlu0 %1832 }
 0x9d5   :  { %2266 = vpow2.f32 %v1821_v10  ;;  %v1838_v20 = vsel %vm157_vm2, %v2554_v56, %v1833_v19 }
 0x9d6   :  { %v1841_v21 = vsel %vm1840_vm6, %v1838_v20, %v2263_v18  ;;  %2268 = vtanh.f32 %v870_v29 }
 0x9d7   :  { %v1844_v22 = vsel %vm1843_vm9, %v1841_v21, %v2265_v15  ;;  %2270 = vtanh.f32 %v1653_v3 }
 0x9d8   :  { %v1847_v23 = vsel %vm1846_vm10, %v1844_v22, 0.0 }
 0x9d9   :  { %1849 = vst [vmem:[%s2714_s15] sm:$0xff] %v1847_v23 }
 0x9df   :  { %v2267_v26 = vpop.eup %2266 }
 0x9e0   :  { %v1823_v28 = vsel %vm1816_vm1, %v2267_v26, 0.0  ;;  %v2269_v4 = vpop.eup %2268 }
 0x9e1   :  { %1824 = vadd.xlane.f32.xlu1 %v1823_v28  ;;  %v2271_v25 = vpop.eup %2270 }
 0x9f2   :  { %1834 = vrot.lane.b32.xlu1 %v1645_v48, %s2305_s5 }
 0xa6e   :  { %v1825_v56 = vpop.xlane.xlu1 %1824 }
 0xa6f   :  { %2272 = vlog2.f32 %v1825_v56 }
 0xa72   :  { %v1835_v30 = vpop.permute.xlu1 %1834 }
 0xa73   :  { %v1839_v31 = vsel %vm157_vm2, %v2552_v55, %v1835_v30 }
 0xa74   :  { %v1842_v12 = vsel %vm1840_vm6, %v1839_v31, %v2269_v4 }
 0xa75   :  { %v1845_v11 = vsel %vm1843_vm9, %v1842_v12, %v2271_v25 }
 0xa76   :  { %v1848_v6 = vsel %vm1846_vm10, %v1845_v11, 0.0 }
 0xa77   :  { %1850 = vst [vmem:[%s2714_s15 + $0x8] sm:$0xff] %v1848_v6 }
 0xa79   :  { %v2273_v57 = vpop.eup %2272 }
 0xa7a   :  { %v1827_v43 = vmul.f32 0.6931472, %v2273_v57 }
 0xa7c   :  { %v1828_v33 = vsub.f32 %v1820_v14, %v1827_v43 }
 0xa7e   :  { %1829 = vst.msk [vmem:[#allocation2] sm:$0x3] %vm1816_vm1, %v1828_v33 }
 0xa7f   :  { %2285 = shalt.err (!%p2282_p4)
}
 0xa80   :  { %s2286_s21 = scalar_lea.hbm %s2715_s16, 32 }
 0xa81   :  { %p2287_p5 = scmp.ne.s32.totalorder %s2715_s16, %s2286_s21  ;;  %p2290_p6 = scmp.lt.u32.totalorder %s2286_s21, %s2715_s16 }
 0xa83   :  { %p2292_p7 = pnand %p2290_p6, %p2287_p5 }
 0xa85   :  { %2295 = shalt.err (!%p2292_p7)
}
 0xa86   :  { %1862 = dma.vmem_to_hbm [thread:$0]  %s1860_s20, 32, %s2715_s16, [#allocation3]  }
 0xa87   :  { %2296 = dma.done.wait [#allocation3], 32  }
 0xa88   :  { %2297 = vsyncadd [#allocation3], 4294967264 }
 0xa89   :  { %1868 = vsyncpa [#allocation3], 1 }

</bundles_post_ra>
